<compile_context>
chip_gen: v7x
topology: tpu7x:2x2x1
jax: 0.10.0
libtpu: 0.0.40
codegen_flags: <defaults>
</compile_context>

<pallas_src>
import jax
import jax.numpy as jnp
from jax.experimental import pallas as pl
from jax.experimental.pallas import tpu as pltpu

LN_EPS = 1e-5                      # nn.LayerNorm default
INV_SQRT2 = 0.7071067811865476     # 1/sqrt(2) for exact (erf) GELU


def mlp_block_kernel(x_ref, g_ref, beta_ref, w1_ref, b1_ref, w2_ref, b2_ref,
                     o_ref, xn_ref, acc_ref):
    j = pl.program_id(1)  # hidden-dim (reduction) chunk index, last grid axis

    # ---- LayerNorm once per token tile (first M-chunk only) ----
    @pl.when(j == 0)
    def _():
        x = x_ref[...].astype(jnp.float32)                          # (tm, D)
        mean = jnp.mean(x, axis=-1, keepdims=True)
        var = jnp.mean(jnp.square(x - mean), axis=-1, keepdims=True)
        xn = (x - mean) * jax.lax.rsqrt(var + LN_EPS)
        xn = xn * g_ref[...] + beta_ref[...]                        # affine
        xn_ref[...] = xn.astype(xn_ref.dtype)                       # cache (bf16)
        acc_ref[...] = jnp.zeros_like(acc_ref)

    # ---- Linear 1 chunk (D -> tk) on the MXU, f32 accumulation ----
    h = jnp.dot(xn_ref[...], w1_ref[...], preferred_element_type=jnp.float32)
    h = h + b1_ref[...]                                             # (tm, tk)

    # ---- GELU (exact erf form: matches nn.GELU default), f32 ----
    h = 0.5 * h * (1.0 + jax.lax.erf(h * INV_SQRT2))

    # ---- (Dropout: identity in eval mode) ----

    # ---- Linear 2 chunk (tk -> D): accumulate into VMEM f32 scratch ----
    acc_ref[...] += jnp.dot(h.astype(w2_ref.dtype), w2_ref[...],
                            preferred_element_type=jnp.float32)

    # ---- finalize on last M-chunk: bias, cast, lane-dense store ----
    @pl.when(j == pl.num_programs(1) - 1)
    def _():
        o_ref[...] = (acc_ref[...] + b2_ref[...]).astype(o_ref.dtype)


def _pick_tk(M, tk):
    """Largest multiple of 128 that divides M and is <= tk (toy fallback: M)."""
    tk = min(int(tk), M)
    if M % 128 == 0:
        best = 128
        c = 128
        while c <= tk:
            if M % c == 0:
                best = c
            c += 128
        return best
    # M not a multiple of 128: only sane for toy sizes -> one full-width chunk.
    return M


def mlp_block(x, gamma, beta, w1, b1, w2, b2, *, tm=None, tk=512,
              compute_dtype=jnp.bfloat16):
    """Fused LayerNorm + MLP forward.

    x: (B, S, D).  w1: (D, M), w2: (M, D) (already transposed vs PyTorch).
    tm: token-row tile (None = auto: 512 on 128-MiB-VMEM chips, 256 on v7x).
    tk: hidden-dim chunk streamed through VMEM (multiple of 128).
    """
    B, S, D = x.shape
    M = w1.shape[1]
    T = B * S

    # --- generation-aware VMEM budget / token tile ---
    try:
        vmem_cap = int(getattr(pltpu.get_tpu_info(), "vmem_capacity_bytes",
                               64 * 1024 * 1024))
    except Exception:  # pragma: no cover - defensive (e.g. interpret mode)
        vmem_cap = 64 * 1024 * 1024
    vmem_limit = min(int(vmem_cap * 0.75), 100 * 1024 * 1024)

    if tm is None:
        tm = 512 if vmem_cap >= 100 * 1024 * 1024 else 256

    # --- tile-size hygiene ---
    tm = max(8, (int(tm) // 8) * 8)            # sublane-aligned row tile
    if T > 8 and pl.cdiv(T, tm) < 2:           # keep >=2 token tiles (megacore)
        tm = max(8, pl.cdiv(pl.cdiv(T, 2), 8) * 8)
    nt = pl.cdiv(T, tm)                        # ragged last tile handled by Pallas

    tk = _pick_tk(M, tk)
    nm = M // tk

    # --- inputs in native / compute dtypes (no host f32 upcast, no padding) ---
    x2 = x.reshape(T, D)
    gamma2 = gamma.reshape(1, D).astype(jnp.float32)
    beta2 = beta.reshape(1, D).astype(jnp.float32)
    w1c = w1.astype(compute_dtype)             # matmul operands in bf16
    w2c = w2.astype(compute_dtype)
    b1_2 = b1.reshape(1, M).astype(jnp.float32)
    b2_2 = b2.reshape(1, D).astype(jnp.float32)

    # --- serpentine weight-chunk order: reuse the chunk at token-tile borders ---
    def _serp_j(i, j):
        return jnp.where(i % 2 == 0, j, nm - 1 - j)

    w_itemsize = jnp.dtype(compute_dtype).itemsize
    bytes_accessed = int(
        T * D * x.dtype.itemsize                      # read x
        + T * D * x.dtype.itemsize                    # write out
        + nt * (w1c.size + w2c.size) * w_itemsize     # weights re-streamed per tile
        + (b1_2.size + b2_2.size + gamma2.size + beta2.size) * 4)
    cost = pl.CostEstimate(flops=4 * T * D * M,       # two matmuls
                           transcendentals=T * M,     # erf
                           bytes_accessed=bytes_accessed)

    out2 = pl.pallas_call(
        mlp_block_kernel,
        out_shape=jax.ShapeDtypeStruct((T, D), x.dtype),
        grid_spec=pltpu.PrefetchScalarGridSpec(
            num_scalar_prefetch=0,
            grid=(nt, nm),                                    # reduction axis last
            in_specs=[
                pl.BlockSpec((tm, D), lambda i, j: (i, 0)),           # x rows
                pl.BlockSpec((1, D), lambda i, j: (0, 0)),            # gamma
                pl.BlockSpec((1, D), lambda i, j: (0, 0)),            # beta
                pl.BlockSpec((D, tk), lambda i, j: (0, _serp_j(i, j))),  # w1 chunk
                pl.BlockSpec((1, tk), lambda i, j: (0, _serp_j(i, j))),  # b1 chunk
                pl.BlockSpec((tk, D), lambda i, j: (_serp_j(i, j), 0)),  # w2 chunk
                pl.BlockSpec((1, D), lambda i, j: (0, 0)),            # b2
            ],
            out_specs=pl.BlockSpec((tm, D), lambda i, j: (i, 0)),
            scratch_shapes=[
                pltpu.VMEM((tm, D), compute_dtype),   # cached LayerNorm output
                pltpu.VMEM((tm, D), jnp.float32),     # second-matmul accumulator
            ],
        ),
        compiler_params=pltpu.CompilerParams(
            dimension_semantics=("parallel", "arbitrary"),
            vmem_limit_bytes=vmem_limit,
        ),
        cost_estimate=cost,
    )(x2, gamma2, beta2, w1c, b1_2, w2c, b2_2)

    return out2.reshape(B, S, D)


def reference_mlp_block(x, gamma, beta, w1, b1, w2, b2,
                        compute_dtype=jnp.bfloat16):
    """Pure-JAX reference with the same bf16-operand / f32-accumulate matmuls."""
    xf = x.astype(jnp.float32)
    mean = jnp.mean(xf, axis=-1, keepdims=True)
    var = jnp.mean(jnp.square(xf - mean), axis=-1, keepdims=True)
    xn = (xf - mean) * jax.lax.rsqrt(var + LN_EPS)
    xn = xn * gamma + beta
    h = jnp.einsum('bsd,dm->bsm', xn.astype(compute_dtype),
                   w1.astype(compute_dtype),
                   preferred_element_type=jnp.float32) + b1
    h = 0.5 * h * (1.0 + jax.lax.erf(h * INV_SQRT2))
    y = jnp.einsum('bsm,md->bsd', h.astype(compute_dtype),
                   w2.astype(compute_dtype),
                   preferred_element_type=jnp.float32) + b2
    return y.astype(x.dtype)


if __name__ == "__main__":
    # Small shapes consistent with the module's forward: (batch, seq, embed_dim).
    # S=100 deliberately exercises the ragged-last-tile path; M/tk exercises the
    # hidden-dim accumulation loop.
    B, S, D, M = 2, 100, 256, 1024
    key = jax.random.PRNGKey(0)
    kx, kw1, kb1, kw2, kb2 = jax.random.split(key, 5)

    x = jax.random.normal(kx, (B, S, D), dtype=jnp.float32)

    # LayerNorm params (PyTorch init: gamma=1, beta=0)
    gamma = jnp.ones((D,), jnp.float32)
    beta = jnp.zeros((D,), jnp.float32)

    # Linear params, deterministic init; stored as (in, out) = PyTorch W.T
    w1 = jax.random.normal(kw1, (D, M), dtype=jnp.float32) * 0.02
    b1 = jax.random.normal(kb1, (M,), dtype=jnp.float32) * 0.02
    w2 = jax.random.normal(kw2, (M, D), dtype=jnp.float32) * 0.02
    b2 = jax.random.normal(kb2, (D,), dtype=jnp.float32) * 0.02

    out = jax.block_until_ready(
        mlp_block(x, gamma, beta, w1, b1, w2, b2, tk=256))

    ref = reference_mlp_block(x, gamma, beta, w1, b1, w2, b2)
    assert out.shape == (B, S, D)
    max_err = float(jnp.max(jnp.abs(out - ref)))
    assert jnp.allclose(out, ref, atol=2e-3, rtol=2e-3), (
        f"mismatch vs reference (max abs err {max_err})")

    print("KERNEL_OK")
</pallas_src>

<mosaic_0001>
module attributes {stable_mosaic.version = 11 : i64} {
  func.func @mlp_block_kernel(%arg0: i32, %arg1: i32, %arg2: memref<104x256xf32, #tpu.memory_space<vmem>>, %arg3: memref<1x256xf32, #tpu.memory_space<vmem>>, %arg4: memref<1x256xf32, #tpu.memory_space<vmem>>, %arg5: memref<256x256xbf16, #tpu.memory_space<vmem>>, %arg6: memref<1x256xf32, #tpu.memory_space<vmem>>, %arg7: memref<256x256xbf16, #tpu.memory_space<vmem>>, %arg8: memref<1x256xf32, #tpu.memory_space<vmem>>, %arg9: memref<104x256xf32, #tpu.memory_space<vmem>>, %arg10: memref<104x256xbf16, #tpu.memory_space<vmem>>, %arg11: memref<104x256xf32, #tpu.memory_space<vmem>>) attributes {dimension_semantics = [#tpu.dimension_semantics<parallel>, #tpu.dimension_semantics<arbitrary>], iteration_bounds = array<i64: 2, 4>, scalar_prefetch = 0 : i64, scratch_operands = 2 : i64, tpu.core_type = #tpu.core_type<tc>, window_params = [{transform_indices = @transform_0, window_bounds = array<i64: 104, 256>}, {pipeline_mode = #tpu.pipeline_mode<synchronous>, transform_indices = @transform_1, window_bounds = array<i64: 1, 256>}, {pipeline_mode = #tpu.pipeline_mode<synchronous>, transform_indices = @transform_2, window_bounds = array<i64: 1, 256>}, {transform_indices = @transform_3, window_bounds = array<i64: 256, 256>}, {transform_indices = @transform_4, window_bounds = array<i64: 1, 256>}, {transform_indices = @transform_5, window_bounds = array<i64: 256, 256>}, {pipeline_mode = #tpu.pipeline_mode<synchronous>, transform_indices = @transform_6, window_bounds = array<i64: 1, 256>}, {transform_indices = @transform_7, window_bounds = array<i64: 104, 256>}]} {
    %c0_i32 = arith.constant 0 : i32
    %0 = arith.cmpi eq, %arg1, %c0_i32 : i32
    %1 = arith.extui %0 : i1 to i32
    %c0_i32_0 = arith.constant 0 : i32
    %2 = arith.cmpi ne, %1, %c0_i32_0 : i32
    scf.if %2 {
      %c0_17 = arith.constant 0 : index
      %c0_18 = arith.constant 0 : index
      %26 = vector.load %arg2[%c0_17, %c0_18] : memref<104x256xf32, #tpu.memory_space<vmem>>, vector<104x256xf32>
      %cst_19 = arith.constant dense<0.000000e+00> : vector<104xf32>
      %27 = vector.multi_reduction <add>, %26, %cst_19 [1] : vector<104x256xf32> to vector<104xf32>
      %28 = vector.shape_cast %27 : vector<104xf32> to vector<104x1xf32>
      %cst_20 = arith.constant 2.560000e+02 : f32
      %29 = vector.broadcast %cst_20 : f32 to vector<104x1xf32>
      %30 = arith.divf %28, %29 : vector<104x1xf32>
      %31 = vector.broadcast %30 : vector<104x1xf32> to vector<104x256xf32>
      %32 = arith.subf %26, %31 : vector<104x256xf32>
      %33 = arith.mulf %32, %32 : vector<104x256xf32>
      %cst_21 = arith.constant dense<0.000000e+00> : vector<104xf32>
      %34 = vector.multi_reduction <add>, %33, %cst_21 [1] : vector<104x256xf32> to vector<104xf32>
      %35 = vector.shape_cast %34 : vector<104xf32> to vector<104x1xf32>
      %cst_22 = arith.constant 2.560000e+02 : f32
      %36 = vector.broadcast %cst_22 : f32 to vector<104x1xf32>
      %37 = arith.divf %35, %36 : vector<104x1xf32>
      %38 = vector.broadcast %30 : vector<104x1xf32> to vector<104x256xf32>
      %39 = arith.subf %26, %38 : vector<104x256xf32>
      %cst_23 = arith.constant 9.99999974E-6 : f32
      %40 = vector.broadcast %cst_23 : f32 to vector<104x1xf32>
      %41 = arith.addf %37, %40 : vector<104x1xf32>
      %42 = math.rsqrt %41 : vector<104x1xf32>
      %43 = vector.broadcast %42 : vector<104x1xf32> to vector<104x256xf32>
      %44 = arith.mulf %39, %43 : vector<104x256xf32>
      %c0_24 = arith.constant 0 : index
      %c0_25 = arith.constant 0 : index
      %45 = vector.load %arg3[%c0_24, %c0_25] : memref<1x256xf32, #tpu.memory_space<vmem>>, vector<1x256xf32>
      %46 = vector.broadcast %45 : vector<1x256xf32> to vector<104x256xf32>
      %47 = arith.mulf %44, %46 : vector<104x256xf32>
      %c0_26 = arith.constant 0 : index
      %c0_27 = arith.constant 0 : index
      %48 = vector.load %arg4[%c0_26, %c0_27] : memref<1x256xf32, #tpu.memory_space<vmem>>, vector<1x256xf32>
      %49 = vector.broadcast %48 : vector<1x256xf32> to vector<104x256xf32>
      %50 = arith.addf %47, %49 : vector<104x256xf32>
      %51 = arith.truncf %50 : vector<104x256xf32> to vector<104x256xbf16>
      %c0_28 = arith.constant 0 : index
      %c0_29 = arith.constant 0 : index
      %52 = vector.load %arg10[%c0_28, %c0_29] : memref<104x256xbf16, #tpu.memory_space<vmem>>, vector<104x256xbf16>
      tpu.vector_store %arg10[%c0_28, %c0_29], %51 {strides = array<i32>} : memref<104x256xbf16, #tpu.memory_space<vmem>>, vector<104x256xbf16>,
      %cst_30 = arith.constant 0.000000e+00 : f32
      %53 = vector.broadcast %cst_30 : f32 to vector<104x256xf32>
      %c0_31 = arith.constant 0 : index
      %c0_32 = arith.constant 0 : index
      %54 = vector.load %arg11[%c0_31, %c0_32] : memref<104x256xf32, #tpu.memory_space<vmem>>, vector<104x256xf32>
      tpu.vector_store %arg11[%c0_31, %c0_32], %53 {strides = array<i32>} : memref<104x256xf32, #tpu.memory_space<vmem>>, vector<104x256xf32>,
    } else {
    }
    %c0 = arith.constant 0 : index
    %c0_1 = arith.constant 0 : index
    %3 = vector.load %arg10[%c0, %c0_1] : memref<104x256xbf16, #tpu.memory_space<vmem>>, vector<104x256xbf16>
    %c0_2 = arith.constant 0 : index
    %c0_3 = arith.constant 0 : index
    %4 = vector.load %arg5[%c0_2, %c0_3] : memref<256x256xbf16, #tpu.memory_space<vmem>>, vector<256x256xbf16>
    %cst = arith.constant dense<0.000000e+00> : vector<104x256xf32>
    %5 = tpu.matmul %3, %4, %cst {dimension_numbers = #tpu.dot_dimension_numbers<[1], [0], [0], [1], [0, 0, 1, 1], [], []>} : vector<104x256xbf16>, vector<256x256xbf16>, vector<104x256xf32> -> vector<104x256xf32>
    %c0_4 = arith.constant 0 : index
    %c0_5 = arith.constant 0 : index
    %6 = vector.load %arg6[%c0_4, %c0_5] : memref<1x256xf32, #tpu.memory_space<vmem>>, vector<1x256xf32>
    %7 = vector.broadcast %6 : vector<1x256xf32> to vector<104x256xf32>
    %8 = arith.addf %5, %7 : vector<104x256xf32>
    %cst_6 = arith.constant 5.000000e-01 : f32
    %9 = vector.broadcast %cst_6 : f32 to vector<104x256xf32>
    %10 = arith.mulf %9, %8 : vector<104x256xf32>
    %cst_7 = arith.constant 0.707106769 : f32
    %11 = vector.broadcast %cst_7 : f32 to vector<104x256xf32>
    %12 = arith.mulf %8, %11 : vector<104x256xf32>
    %13 = math.erf %12 : vector<104x256xf32>
    %cst_8 = arith.constant 1.000000e+00 : f32
    %14 = vector.broadcast %cst_8 : f32 to vector<104x256xf32>
    %15 = arith.addf %14, %13 : vector<104x256xf32>
    %16 = arith.mulf %10, %15 : vector<104x256xf32>
    %c0_9 = arith.constant 0 : index
    %c0_10 = arith.constant 0 : index
    %17 = vector.load %arg11[%c0_9, %c0_10] : memref<104x256xf32, #tpu.memory_space<vmem>>, vector<104x256xf32>
    %18 = arith.truncf %16 : vector<104x256xf32> to vector<104x256xbf16>
    %c0_11 = arith.constant 0 : index
    %c0_12 = arith.constant 0 : index
    %19 = vector.load %arg7[%c0_11, %c0_12] : memref<256x256xbf16, #tpu.memory_space<vmem>>, vector<256x256xbf16>
    %cst_13 = arith.constant dense<0.000000e+00> : vector<104x256xf32>
    %20 = tpu.matmul %18, %19, %cst_13 {dimension_numbers = #tpu.dot_dimension_numbers<[1], [0], [0], [1], [0, 0, 1, 1], [], []>} : vector<104x256xbf16>, vector<256x256xbf16>, vector<104x256xf32> -> vector<104x256xf32>
    %21 = arith.addf %17, %20 : vector<104x256xf32>
    %c0_14 = arith.constant 0 : index
    %c0_15 = arith.constant 0 : index
    %22 = vector.load %arg11[%c0_14, %c0_15] : memref<104x256xf32, #tpu.memory_space<vmem>>, vector<104x256xf32>
    tpu.vector_store %arg11[%c0_14, %c0_15], %21 {strides = array<i32>} : memref<104x256xf32, #tpu.memory_space<vmem>>, vector<104x256xf32>,
    %c3_i32 = arith.constant 3 : i32
    %23 = arith.cmpi eq, %arg1, %c3_i32 : i32
    %24 = arith.extui %23 : i1 to i32
    %c0_i32_16 = arith.constant 0 : i32
    %25 = arith.cmpi ne, %24, %c0_i32_16 : i32
    scf.if %25 {
      %c0_17 = arith.constant 0 : index
      %c0_18 = arith.constant 0 : index
      %26 = vector.load %arg11[%c0_17, %c0_18] : memref<104x256xf32, #tpu.memory_space<vmem>>, vector<104x256xf32>
      %c0_19 = arith.constant 0 : index
      %c0_20 = arith.constant 0 : index
      %27 = vector.load %arg8[%c0_19, %c0_20] : memref<1x256xf32, #tpu.memory_space<vmem>>, vector<1x256xf32>
      %28 = vector.broadcast %27 : vector<1x256xf32> to vector<104x256xf32>
      %29 = arith.addf %26, %28 : vector<104x256xf32>
      %c0_21 = arith.constant 0 : index
      %c0_22 = arith.constant 0 : index
      %30 = vector.load %arg9[%c0_21, %c0_22] : memref<104x256xf32, #tpu.memory_space<vmem>>, vector<104x256xf32>
      tpu.vector_store %arg9[%c0_21, %c0_22], %29 {strides = array<i32>} : memref<104x256xf32, #tpu.memory_space<vmem>>, vector<104x256xf32>,
    } else {
    }
    return
  }
  func.func @transform_0(%arg0: i32, %arg1: i32) -> (i32, i32) {
    %c0_i32 = arith.constant 0 : i32
    %c0_i32_0 = arith.constant 0 : i32
    return %arg0, %c0_i32 : i32, i32
  }
  func.func @transform_1(%arg0: i32, %arg1: i32) -> (i32, i32) {
    %c0_i32 = arith.constant 0 : i32
    %c0_i32_0 = arith.constant 0 : i32
    %c0_i32_1 = arith.constant 0 : i32
    return %c0_i32, %c0_i32_0 : i32, i32
  }
  func.func @transform_2(%arg0: i32, %arg1: i32) -> (i32, i32) {
    %c0_i32 = arith.constant 0 : i32
    %c0_i32_0 = arith.constant 0 : i32
    %c0_i32_1 = arith.constant 0 : i32
    return %c0_i32, %c0_i32_0 : i32, i32
  }
  func.func @transform_3(%arg0: i32, %arg1: i32) -> (i32, i32) {
    %c2_i32 = arith.constant 2 : i32
    %c0_i32 = arith.constant 0 : i32
    %0 = arith.cmpi eq, %c2_i32, %c0_i32 : i32
    %c1_i32 = arith.constant 1 : i32
    %1 = arith.select %0, %c1_i32, %c2_i32 : i32
    %2 = arith.remsi %arg0, %1 : i32
    %c0_i32_0 = arith.constant 0 : i32
    %3 = arith.cmpi ne, %2, %c0_i32_0 : i32
    %c0_i32_1 = arith.constant 0 : i32
    %4 = arith.cmpi slt, %2, %c0_i32_1 : i32
    %c0_i32_2 = arith.constant 0 : i32
    %5 = arith.cmpi slt, %1, %c0_i32_2 : i32
    %6 = arith.xori %4, %5 : i1
    %7 = arith.andi %6, %3 : i1
    %8 = arith.addi %2, %1 : i32
    %9 = arith.select %7, %8, %2 : i32
    %c0_i32_3 = arith.constant 0 : i32
    %10 = arith.cmpi eq, %9, %c0_i32_3 : i32
    %c3_i32 = arith.constant 3 : i32
    %11 = arith.subi %c3_i32, %arg1 : i32
    %12 = arith.select %10, %arg1, %11 : i32
    %c0_i32_4 = arith.constant 0 : i32
    %c0_i32_5 = arith.constant 0 : i32
    return %c0_i32_4, %12 : i32, i32
  }
  func.func @transform_4(%arg0: i32, %arg1: i32) -> (i32, i32) {
    %c2_i32 = arith.constant 2 : i32
    %c0_i32 = arith.constant 0 : i32
    %0 = arith.cmpi eq, %c2_i32, %c0_i32 : i32
    %c1_i32 = arith.constant 1 : i32
    %1 = arith.select %0, %c1_i32, %c2_i32 : i32
    %2 = arith.remsi %arg0, %1 : i32
    %c0_i32_0 = arith.constant 0 : i32
    %3 = arith.cmpi ne, %2, %c0_i32_0 : i32
    %c0_i32_1 = arith.constant 0 : i32
    %4 = arith.cmpi slt, %2, %c0_i32_1 : i32
    %c0_i32_2 = arith.constant 0 : i32
    %5 = arith.cmpi slt, %1, %c0_i32_2 : i32
    %6 = arith.xori %4, %5 : i1
    %7 = arith.andi %6, %3 : i1
    %8 = arith.addi %2, %1 : i32
    %9 = arith.select %7, %8, %2 : i32
    %c0_i32_3 = arith.constant 0 : i32
    %10 = arith.cmpi eq, %9, %c0_i32_3 : i32
    %c3_i32 = arith.constant 3 : i32
    %11 = arith.subi %c3_i32, %arg1 : i32
    %12 = arith.select %10, %arg1, %11 : i32
    %c0_i32_4 = arith.constant 0 : i32
    %c0_i32_5 = arith.constant 0 : i32
    return %c0_i32_4, %12 : i32, i32
  }
  func.func @transform_5(%arg0: i32, %arg1: i32) -> (i32, i32) {
    %c2_i32 = arith.constant 2 : i32
    %c0_i32 = arith.constant 0 : i32
    %0 = arith.cmpi eq, %c2_i32, %c0_i32 : i32
    %c1_i32 = arith.constant 1 : i32
    %1 = arith.select %0, %c1_i32, %c2_i32 : i32
    %2 = arith.remsi %arg0, %1 : i32
    %c0_i32_0 = arith.constant 0 : i32
    %3 = arith.cmpi ne, %2, %c0_i32_0 : i32
    %c0_i32_1 = arith.constant 0 : i32
    %4 = arith.cmpi slt, %2, %c0_i32_1 : i32
    %c0_i32_2 = arith.constant 0 : i32
    %5 = arith.cmpi slt, %1, %c0_i32_2 : i32
    %6 = arith.xori %4, %5 : i1
    %7 = arith.andi %6, %3 : i1
    %8 = arith.addi %2, %1 : i32
    %9 = arith.select %7, %8, %2 : i32
    %c0_i32_3 = arith.constant 0 : i32
    %10 = arith.cmpi eq, %9, %c0_i32_3 : i32
    %c3_i32 = arith.constant 3 : i32
    %11 = arith.subi %c3_i32, %arg1 : i32
    %12 = arith.select %10, %arg1, %11 : i32
    %c0_i32_4 = arith.constant 0 : i32
    %c0_i32_5 = arith.constant 0 : i32
    return %12, %c0_i32_4 : i32, i32
  }
  func.func @transform_6(%arg0: i32, %arg1: i32) -> (i32, i32) {
    %c0_i32 = arith.constant 0 : i32
    %c0_i32_0 = arith.constant 0 : i32
    %c0_i32_1 = arith.constant 0 : i32
    return %c0_i32, %c0_i32_0 : i32, i32
  }
  func.func @transform_7(%arg0: i32, %arg1: i32) -> (i32, i32) {
    %c0_i32 = arith.constant 0 : i32
    %c0_i32_0 = arith.constant 0 : i32
    return %arg0, %c0_i32 : i32, i32
  }
}

</mosaic_0001>

<bundles_post_ra>
// kernel: tpu_custom_call.1
= control target key start
LH: loop header
LB: loop body
LE: loop exit
PB: predicated region body
PF: predicated region fallthrough
CT: control target
= control target key end

     0   :  { %s3881_s0 = inlined_call_operand.hbm [shape: f32[200,256], index: 0, kind: input, shape index: {}]   ;;  %s3882_s1 = inlined_call_operand.vmem [shape: f32[1,256], index: 1, kind: input, shape index: {}]   ;;  %s3883_s2 = inlined_call_operand.vmem [shape: f32[1,256], index: 2, kind: input, shape index: {}]   ;;  %s3884_s3 = inlined_call_operand.hbm [shape: bf16[256,1024], index: 3, kind: input, shape index: {}]   ;;  %s3885_s4 = inlined_call_operand.vmem [shape: f32[1,1024], index: 4, kind: input, shape index: {}]   ;;  %s3886_s5 = inlined_call_operand.hbm [shape: bf16[1024,256], index: 5, kind: input, shape index: {}]   ;;  %s3887_s6 = inlined_call_operand.vmem [shape: f32[1,256], index: 6, kind: input, shape index: {}]   ;;  %s3888_s7 = inlined_call_operand.hbm [shape: f32[200,256], index: 7, kind: output, shape index: {}]  }
   0x1   :  { %3896 = sst [smem:[#allocation21_spill]] %s3881_s0 }
   0x2   :  { %3897 = sst [smem:[#allocation22_spill]] %s3882_s1 }
   0x3   :  { %3898 = sst [smem:[#allocation23_spill]] %s3883_s2 }
   0x4   :  { %3899 = sst [smem:[#allocation24_spill]] %s3887_s6 }
   0x5   :  { %3900 = sst [smem:[#allocation25_spill]] %s3888_s7 }
   0x6   :  { %12 = vsyncpa [#allocation5], 0 }
   0x7   :  { %14 = vsyncpa [#allocation5 + $0x1], 0 }
   0x8   :  { %15 = vsyncpa [#allocation8], 0 }
   0x9   :  { %17 = vsyncpa [#allocation8 + $0x1], 0 }
   0xa   :  { %18 = vsyncpa [#allocation6], 0 }
   0xb   :  { %20 = vsyncpa [#allocation6 + $0x1], 0  ;;  %s2981_s24 = smov 0   ;;  %s2983_s25 = smov 0  }
   0xc   :  { %s2985_s26 = smov 0   ;;  %s2987_s27 = smov 0  }
   0xd   :  { %s2989_s28 = smov 0   ;;  %s2991_s29 = smov 0  }
   0xe   :  { %s2993_s30 = smov 0   ;;  %s2995_s8 = smov 0  }
   0xf   :  { %s2997_s9 = smov 0   ;;  %s2999_s10 = smov 0  }
  0x10   :  { %s3001_s11 = smov 0  }
  0x11 LB: > { %3901 = sst [smem:[#allocation14_spill]] %s2907_s29  ;;  %s3037_s12 = sadd.s32 4294967295, %s2927_s11   ;;  %s2927_s11 = sphi %s3001_s11, %s26_s11   ;;  %s2923_s10 = sphi %s2999_s10, %s3928_s10   ;;  %s2919_s9 = sphi %s2997_s9, %s3927_s9   ;;  %s2915_s8 = sphi %s2995_s8, %s3926_s8   ;;  %s2911_s30 = sphi %s2993_s30, %s3925_s30   ;;  %s2907_s29 = sphi %s2991_s29, %s3924_s29   ;;  %s2903_s28 = sphi %s2989_s28, %s3933_s28   ;;  %s2899_s27 = sphi %s2987_s27, %s3932_s27   ;;  %s2895_s26 = sphi %s2985_s26, %s3931_s26   ;;  %s2891_s25 = sphi %s2983_s25, %s3930_s25   ;;  %s2887_s24 = sphi %s2981_s24, %s3929_s24  }
  0x12   : > { %3902 = sst [smem:[#allocation15_spill]] %s2919_s9  ;;  %s35_s13 = sadd.s32 1, %s2919_s9 }
  0x13   : > { %3903 = sst [smem:[#allocation16_spill]] %s2923_s10  ;;  %s38_s14 = sadd.s32 1, %s2923_s10 }
  0x14   : > { %p36_p0 = scmp.ge.s32.totalorder %s35_s13, 4  ;;  %s45_s15 = sadd.s32 1, %s2907_s29 }
  0x15   : > { %p52_p1 = scmp.ne.s32.totalorder %s2907_s29, %s2903_s28  ;;  %p53_p2 = scmp.eq.s32.totalorder %s2927_s11, 0 }
  0x16   : > { %s3935_s13 = smov (%p36_p0, %s35_s13), 0  ;;  %s3937_s14 = smov (!%p36_p0, %s38_s14), %s2923_s10 }
  0x17   : > { %3904 = sst [smem:[#allocation17_spill]] %s3935_s13  ;;  %p3053_p3 = por %p53_p2, %p52_p1 }
  0x18   : > { %p58_p4 = scmp.ne.s32.totalorder %s2903_s28, %s2899_s27  ;;  %p40_p5 = scmp.ge.s32.totalorder %s3937_s14, 2 }
  0x19   : > { %p59_p6 = scmp.eq.s32.totalorder %s3037_s12, 0  ;;  %s111_s17 = ssub.s32 0, %s2923_s10 }
  0x1a   : > { %s3939_s14 = smov (%p40_p5, %s3937_s14), 0  ;;  %s2241_s19 = smin.u32 %s2923_s10, %s111_s17 }
  0x1b   : > { %3906 = sst [smem:[#allocation18_spill]] %s3939_s14  ;;  %p3068_p7 = por %p59_p6, %p58_p4 }
  0x1c   : > { %s42_s20 = ssub.s32 %s2923_s10, %s3939_s14  ;;  %s113_s21 = sand.u32 1, %s2241_s19  }
  0x1d   : > { %p43_p8 = scmp.eq.s32.totalorder %s42_s20, 0  ;;  %p2243_p9 = scmp.lt.s32.totalorder %s113_s21, 0 }
  0x1e   : > { %s120_s23 = sadd.s32 2, %s113_s21  ;;  %s2240_s7 = sadd.s32 4294967294, %s2927_s11  }
  0x1f   : > { %s3076_s22 = scalar_select %p43_p8, %s2907_s29, %s45_s15  }
  0x20   : > { %s123_s6 = ssub.s32 3, %s2919_s9  ;;  %s3941_s23 = smov (!%p2243_p9, %s120_s23), %s113_s21 }
  0x21   : > { %3908 = sst [smem:[#allocation19_spill]] %s3076_s22  ;;  %s126_s17 = ssub.s32 0, %s3939_s14 }
  0x22   : > { %p122_p10 = scmp.eq.s32.totalorder %s3941_s23, 0  ;;  %s2244_s2 = smin.u32 %s126_s17, %s3939_s14 }
  0x23   : > { %s128_s19 = sand.u32 1, %s2244_s2   ;;  %s138_s1 = ssub.s32 3, %s3935_s13 }
  0x24   : > { %s3084_s15 = scalar_select %p122_p10, %s2919_s9, %s123_s6 }
  0x25   : > { %p150_p11 = scmp.ne.s32.totalorder %s2895_s26, %s2891_s25  ;;  %p156_p13 = scmp.ne.s32.totalorder %s2891_s25, %s2887_s24 }
  0x26   : > { %p2246_p0 = scmp.lt.s32.totalorder %s128_s19, 0  ;;  %s135_s21 = sadd.s32 2, %s128_s19 }
  0x27   : > { %p3090_p12 = por %p150_p11, %p53_p2  ;;  %p3098_p5 = por %p156_p13, %p59_p6 }
  0x28   : > { %p313_p8 = scmp.eq.s32.totalorder %s3037_s12, 7  ;;  %s3943_s21 = smov (!%p2246_p0, %s135_s21), %s128_s19 }
  0x29   : > { %s3910_s23 = scalar_select %p3098_p5, 1, 0 }
  0x2a   : > { %p3106_p9 = por %p313_p8, %p52_p1  ;;  %p319_p10 = scmp.eq.s32.totalorder %s2240_s7, 7 }
  0x2b   : > { %p137_p2 = scmp.eq.s32.totalorder %s3943_s21, 0  ;;  %s143_s14 = sadd.s32 1, %s2895_s26 }
  0x2c   : > { %s3911_s2 = scalar_select %p3106_p9, 1, 0 }
  0x2d   : > { %p3113_p11 = por %p319_p10, %p58_p4  ;;  %p2260_p13 = scmp.ge.s32.totalorder %s2927_s11, 8 }
  0x2e   : > { %s139_s24 = scalar_select %p137_p2, %s3935_s13, %s138_s1 }
  0x2f   : > { %s3912_s6 = scalar_select %p3113_p11, 1, 0 }
  0x30   : > { %s140_s17 = ssub.s32 %s3084_s15, %s139_s24  ;;  %344 = sbr.rel (%p2260_p13) target bundleno = 146 (0x92), region = 28 }
  0x31   : > { %p141_p6 = scmp.eq.s32.totalorder %s140_s17, 0 }
  0x33   : > { %s3121_s9 = scalar_select %p141_p6, %s2895_s26, %s143_s14  }
  0x35   : > { %3913 = sst [smem:[#allocation20_spill]] %s3121_s9 }
  0x37   : > { %347 = sbr.rel (!%p3053_p3) target bundleno = 95 (0x5f), region = 32  ;;  %s348_s7 = sand.u32 (%p3053_p3), 1, %s2907_s29  }
  0x38   : > { %s353_s19 = smul.u32 (%p3053_p3), 13, %s2923_s10  ;;  %s3131_s14 = scalar_lea.sflag (%p3053_p3), [#allocation5], %s348_s7 }
  0x39   : > { %s2414_s21 = smul.u32 (%p3053_p3), 208, %s348_s7 }
  0x3a   : > { %s354_s22 = ssub.s32 (%p3053_p3), 25, %s353_s19 }
  0x3b   : > { %p355_p1 = scmp.lt.s32.totalorder (%p3053_p3), %s354_s22, 13  ;;  %s352_s17 = scalar_lea.vmem (%p3053_p3), [#allocation4], %s2414_s21 }
  0x3e   : > { %s3945_s22 = smov (!%p355_p1, %s354_s22), 13 }
  0x3f   : > { %s3128_s1 = sshll.u32 %s3945_s22, 8 }
  0x40   : > { %s360_s24 = ssub.s32 3328, %s3128_s1 }
  0x41   : > { %361 = vsyncadd %s3131_s14, %s360_s24  ;;  %p2263_p3 = scmp.ne.s32.totalorder %s3128_s1, 0  ;;  %s2412_s16 = smul.u32 3328, %s2923_s10 }
  0x42   : > { %s367_s13 = sshll.u32 %s352_s17, 4  ;;  %s3914_s0 = sld [smem:[#allocation21_spill]]  ;;  %s3141_s13 = int_to_ptr.vmem [resolvable:$true] %s367_s13 }
  0x48   : > { %s3139_s9 = scalar_lea.hbm %s3914_s0, %s2412_s16  ;;  %s2721_s24 = scalar_lea.hbm %s3914_s0, 6400 }
  0x49   : > { %s2717_s22 = scalar_lea.hbm %s3139_s9, %s3128_s1  ;;  %p2722_p10 = scmp.lt.u32.totalorder %s3139_s9, %s3914_s0 }
  0x4a   : > { %p2718_p4 = scmp.ne.s32.totalorder %s3139_s9, %s2717_s22  ;;  %p2723_p2 = scmp.lt.u32.totalorder %s2721_s24, %s2717_s22 }
  0x4b   : > { %p2725_p13 = scmp.lt.u32.totalorder %s2717_s22, %s3139_s9 }
  0x4c   : > { %p2719_p0 = pnand %p2718_p4, %p2263_p3  ;;  %p2724_p6 = por %p2723_p2, %p2722_p10 }
  0x4e   : > { %p2720_p8 = pneg %p2719_p0  ;;  %p2726_p1 = por %p2725_p13, %p2724_p6 }
  0x50   : > { %p2727_p11 = pnand %p2726_p1, %p2720_p8 }
  0x52   : > { %2730 = shalt.err (!%p2727_p11)
}
  0x53   : > { %s2731_s29 = scalar_lea.vmem %s3141_s13, %s3128_s1  ;;  %s2929_s16 = smov [#allocation4]  }
  0x54   : > { %p2732_p4 = scmp.ne.s32.totalorder %s3141_s13, %s2731_s29  ;;  %s2735_s19 = sshll.u32 %s2929_s16, 4  ;;  %s2736_s19 = int_to_ptr.vmem [resolvable:$false] %s2735_s19 }
  0x55   : > { %s2737_s10 = scalar_lea.vmem %s2736_s19, 6656  ;;  %p2738_p5 = scmp.lt.s32.totalorder %s3141_s13, %s2736_s19 }
  0x56   : > { %p2733_p0 = pnand %p2732_p4, %p2263_p3  ;;  %p2739_p10 = scmp.lt.s32.totalorder %s2737_s10, %s2731_s29 }
  0x58   : > { %p2734_p9 = pneg %p2733_p0  ;;  %p2740_p2 = por %p2739_p10, %p2738_p5 }
  0x5a   : > { %p2741_p6 = pnand %p2740_p2, %p2734_p9 }
  0x5c   : > { %2744 = shalt.err (!%p2741_p6)
}
  0x5d   : > { %s2930_s22 = smov 256   ;;  %s2931_s7 = smov 16  }
  0x5e   : > { %373 = dma.hbm_to_vmem [thread:$0]  (%p2263_p3), %s3139_s9, %s3128_s1, %s3141_s13, %s3131_s14, %s2930_s22, %s2930_s22, %s2931_s7  }
  0x5f PF: > { %s377_s21 = sand.u32 1, %s2927_s11   ;;  %s379_s24 = sand.u32 1, %s2895_s26  }
  0x60   : > { %s3170_s17 = sshll.u32 %s379_s24, 8  ;;  %s2393_s29 = sshll.u32 %s3084_s15, 7 }
  0x61   : > { %s3176_s10 = scalar_lea.hbm %s3884_s3, %s2393_s29  ;;  %s381_s9 = scalar_lea.vmem [#allocation7], %s3170_s17 }
  0x62   : > { %s403_s13 = sshll.u32 %s381_s9, 4  ;;  %s3181_s1 = scalar_lea.sflag [#allocation8], %s377_s21  ;;  %s3179_s13 = int_to_ptr.vmem [resolvable:$true] %s403_s13 }
  0x63   : > { %s2745_s14 = scalar_lea.hbm %s3176_s10, 4096  ;;  %s2749_s24 = scalar_lea.hbm %s3884_s3, 16384 }
  0x64   : > { %p2746_p5 = scmp.ne.s32.totalorder %s3176_s10, %s2745_s14  ;;  %p2750_p3 = scmp.lt.u32.totalorder %s3176_s10, %s3884_s3 }
  0x65   : > { %p2751_p8 = scmp.lt.u32.totalorder %s2749_s24, %s2745_s14  ;;  %p2753_p1 = scmp.lt.u32.totalorder %s2745_s14, %s3176_s10 }
  0x66   : > { %p2747_p9 = pnand %p2746_p5, %p3090_p12 }
  0x67   : > { %p2752_p13 = por %p2751_p8, %p2750_p3 }
  0x68   : > { %p2748_p11 = pneg %p2747_p9 }
  0x69   : > { %p2754_p4 = por %p2753_p1, %p2752_p13 }
  0x6b   : > { %p2755_p0 = pnand %p2754_p4, %p2748_p11 }
  0x6d   : > { %2758 = shalt.err (!%p2755_p0)
}
  0x6e   : > { %s2759_s21 = scalar_lea.vmem %s3179_s13, 4096  ;;  %s2932_s19 = smov [#allocation7]  }
  0x6f   : > { %p2760_p10 = scmp.ne.s32.totalorder %s3179_s13, %s2759_s21  ;;  %s2763_s9 = sshll.u32 %s2932_s19, 4  ;;  %s2764_s9 = int_to_ptr.vmem [resolvable:$false] %s2763_s9 }
  0x70   : > { %s2765_s22 = scalar_lea.vmem %s2764_s9, 8192  ;;  %p2766_p5 = scmp.lt.s32.totalorder %s3179_s13, %s2764_s9 }
  0x71   : > { %p2761_p2 = pnand %p2760_p10, %p3090_p12  ;;  %p2767_p9 = scmp.lt.s32.totalorder %s2765_s22, %s2759_s21 }
  0x73   : > { %p2762_p6 = pneg %p2761_p2  ;;  %p2768_p3 = por %p2767_p9, %p2766_p5 }
  0x75   : > { %p2769_p8 = pnand %p2768_p3, %p2762_p6 }
  0x77   : > { %2772 = shalt.err (!%p2769_p8)
}
  0x78   : > { %s2933_s14 = smov 512   ;;  %s2934_s7 = smov 128  }
  0x79   : > { %s2935_s24 = smov 8   ;;  %s2395_s29 = sshll.u32 %s3084_s15, 12 }
  0x7a   : > { %2416 = dma.hbm_to_vmem [thread:$0]  (%p3090_p12), %s3176_s10, 4096, %s3179_s13, %s3181_s1, %s2933_s14, %s2934_s7, %s2935_s24  }
  0x7b   : > { %s3211_s19 = scalar_lea.hbm %s3886_s5, %s2395_s29  ;;  %s455_s9 = scalar_lea.vmem [#allocation9], %s3170_s17 }
  0x7c   : > { %s478_s22 = sshll.u32 %s455_s9, 4  ;;  %s2773_s0 = scalar_lea.hbm %s3211_s19, 4096  ;;  %s3214_s22 = int_to_ptr.vmem [resolvable:$true] %s478_s22 }
  0x7d   : > { %p2774_p11 = scmp.ne.s32.totalorder %s3211_s19, %s2773_s0  ;;  %s2777_s13 = scalar_lea.hbm %s3886_s5, 16384 }
  0x7e   : > { %p2778_p4 = scmp.lt.u32.totalorder %s3211_s19, %s3886_s5  ;;  %p2779_p0 = scmp.lt.u32.totalorder %s2777_s13, %s2773_s0 }
  0x7f   : > { %p2775_p13 = pnand %p2774_p11, %p3090_p12  ;;  %p2781_p2 = scmp.lt.u32.totalorder %s2773_s0, %s3211_s19 }
  0x80   : > { %p2780_p10 = por %p2779_p0, %p2778_p4 }
  0x81   : > { %p2776_p1 = pneg %p2775_p13 }
  0x82   : > { %p2782_p6 = por %p2781_p2, %p2780_p10 }
  0x84   : > { %p2783_p5 = pnand %p2782_p6, %p2776_p1 }
  0x86   : > { %2786 = shalt.err (!%p2783_p5)
}
  0x87   : > { %s2787_s17 = scalar_lea.vmem %s3214_s22, 4096  ;;  %s2936_s16 = smov [#allocation9]  }
  0x88   : > { %p2788_p9 = scmp.ne.s32.totalorder %s3214_s22, %s2787_s17  ;;  %s2791_s21 = sshll.u32 %s2936_s16, 4  ;;  %s2792_s21 = int_to_ptr.vmem [resolvable:$false] %s2791_s21 }
  0x89   : > { %s2793_s9 = scalar_lea.vmem %s2792_s21, 8192  ;;  %p2794_p11 = scmp.lt.s32.totalorder %s3214_s22, %s2792_s21 }
  0x8a   : > { %p2789_p3 = pnand %p2788_p9, %p3090_p12  ;;  %p2795_p13 = scmp.lt.s32.totalorder %s2793_s9, %s2787_s17 }
  0x8c   : > { %p2790_p8 = pneg %p2789_p3  ;;  %p2796_p4 = por %p2795_p13, %p2794_p11 }
  0x8e   : > { %p2797_p0 = pnand %p2796_p4, %p2790_p8 }
  0x90   : > { %2800 = shalt.err (!%p2797_p0)
}
  0x91   : > { %2417 = dma.hbm_to_vmem [thread:$0]  (%p3090_p12), %s3211_s19, 4096, %s3214_s22, %s3181_s1, %s2934_s7, %s2934_s7, %s2935_s24  }
  0x92 PF: > { %p2281_p1 = scmp.ge.s32.totalorder %s2927_s11, 1  ;;  %p486_p10 = scmp.lt.s32.totalorder %s2927_s11, 9 }
  0x94   : > { %p487_p2 = pnand %p2281_p1, %p486_p10 }
  0x95   : > { %s3244_s0 = sand.u32 (!%p487_p2), 1, %s2903_s28  }
  0x96   : > { %490 = sbr.rel (%p487_p2) target bundleno = 1136 (0x470), region = 48  ;;  %s493_s10 = scalar_lea.sflag (!%p487_p2), [#allocation5], %s3244_s0 }
  0x97   : > { %s2415_s20 = smul.u32 (!%p487_p2), 208, %s3244_s0 }
  0x99   : > { %s3248_s15 = scalar_lea.vmem (!%p487_p2), [#allocation4], %s2415_s20 }
  0x9d   : > { %2874 = dma.done.wait (%p3068_p7), %s493_s10, 3328  }
  0x9e   : > { %2876 = vsyncadd (%p3068_p7), %s493_s10, 4294963968  ;;  %s501_s1 = sand.u32 1, %s3037_s12   ;;  %s503_s7 = sand.u32 1, %s2891_s25  }
  0x9f   : > { %s2282_s24 = sshll.u32 %s503_s7, 8  ;;  %s502_s19 = scalar_lea.sflag [#allocation8], %s501_s1 }
  0xa0   : > { %s3256_s22 = scalar_lea.vmem [#allocation7], %s2282_s24  ;;  %p3915_p12 = scmp.ne.s32.totalorder %s3910_s23, 0 }
  0xa2   : > { %2878 = dma.done.wait (%p3915_p12), %s502_s19, 8192  }
  0xa3   : > { %2880 = vsyncadd (%p3915_p12), %s502_s19, 4294959104  ;;  %p596_p7 = scmp.lt.s32.totalorder %s2915_s8, 0  ;;  %s597_s18 = ssub.s32 0, %s2915_s8 }
  0xa4   : > { %s2284_s13 = smin.u32 %s2915_s8, %s597_s18  ;;  %s609_s17 = ssub.s32 3, %s2911_s30 }
  0xa5   : > { %s599_s14 = sand.u32 1, %s2284_s13   ;;  %s3273_s1 = scalar_lea.vmem [#allocation9], %s2282_s24 }
  0xa6   : > { %s600_s12 = ssub.s32 0, %s599_s14  ;;  %s3275_s7 = scalar_lea.vmem [#allocation10], %s2415_s20 }
  0xa7   : > { %s3947_s12 = smov (!%p596_p7, %s600_s12), %s599_s14  ;;  %p2288_p3 = scmp.ne.s32.totalorder %s2911_s30, 0 }
  0xa8   : > { %p2286_p6 = scmp.lt.s32.totalorder %s3947_s12, 0  ;;  %s606_s29 = sadd.s32 2, %s3947_s12  ;;  %v657_v0 = vld [vmem:[%s3248_s15] sm:$0xff] (!%p2288_p3)  ;;  %v658_v1 = vld [vmem:[%s3248_s15 + $0x8] sm:$0xff] (!%p2288_p3)  ;;  %v3283_v5 = vld [vmem:[%s3248_s15 + $0x10] sm:$0xff] (!%p2288_p3) }
  0xa9   : > { %v661_v2 = vld [vmem:[%s3248_s15 + $0x20] sm:$0xff] (!%p2288_p3)  ;;  %v683_v3 = vadd.f32 (!%p2288_p3), %v658_v1, %v657_v0  ;;  %v662_v4 = vld [vmem:[%s3248_s15 + $0x28] sm:$0xff] (!%p2288_p3)  ;;  %v3286_v6 = vld [vmem:[%s3248_s15 + $0x18] sm:$0xff] (!%p2288_p3)  ;;  %s3916_s24 = sld [smem:[#allocation22_spill]] (!%p2288_p3)  ;;  %s3917_s13 = sld [smem:[#allocation23_spill]] (!%p2288_p3) }
  0xaa   : > { %s3949_s29 = smov (!%p2286_p6, %s606_s29), %s3947_s12  ;;  %v689_v7 = vadd.f32 (!%p2288_p3), %v662_v4, %v661_v2  ;;  %v3289_v8 = vld [vmem:[%s3248_s15 + $0x30] sm:$0xff] (!%p2288_p3)  ;;  %v3292_v9 = vld [vmem:[%s3248_s15 + $0x38] sm:$0xff] (!%p2288_p3)  ;;  %v686_v10 = vadd.f32 (!%p2288_p3), %v3286_v6, %v3283_v5  ;;  %v3299_v12 = vld [vmem:[%s3248_s15 + $0x40] sm:$0xff] (!%p2288_p3) }
  0xab   : > { %p608_p5 = scmp.eq.s32.totalorder %s3949_s29, 0  ;;  %684 = vadd.xlane.f32.xlu0 (!%p2288_p3), %v683_v3  ;;  %v692_v11 = vadd.f32 (!%p2288_p3), %v3292_v9, %v3289_v8  ;;  %v3302_v13 = vld [vmem:[%s3248_s15 + $0x48] sm:$0xff] (!%p2288_p3)  ;;  %v3305_v14 = vld [vmem:[%s3248_s15 + $0x50] sm:$0xff] (!%p2288_p3)  ;;  %v3308_v15 = vld [vmem:[%s3248_s15 + $0x58] sm:$0xff] (!%p2288_p3) }
  0xac   : > { %690 = vadd.xlane.f32.xlu1 (!%p2288_p3), %v689_v7  ;;  %v695_v16 = vadd.f32 (!%p2288_p3), %v3302_v13, %v3299_v12  ;;  %v698_v17 = vadd.f32 (!%p2288_p3), %v3308_v15, %v3305_v14  ;;  %v3315_v18 = vld [vmem:[%s3248_s15 + $0x60] sm:$0xff] (!%p2288_p3)  ;;  %v3318_v19 = vld [vmem:[%s3248_s15 + $0x68] sm:$0xff] (!%p2288_p3)  ;;  %v3321_v20 = vld [vmem:[%s3248_s15 + $0x70] sm:$0xff] (!%p2288_p3) }
  0xad   : > { %s610_s16 = scalar_select %p608_p5, %s2911_s30, %s609_s17 }
  0xae   : > { %656 = sbr.rel (%p2288_p3) target bundleno = 522 (0x20a), region = 64  ;;  %v3324_v21 = vld [vmem:[%s3248_s15 + $0x78] sm:$0xff] (!%p2288_p3)  ;;  %v701_v22 = vadd.f32 (!%p2288_p3), %v3318_v19, %v3315_v18  ;;  %v3331_v24 = vld [vmem:[%s3248_s15 + $0x80] sm:$0xff] (!%p2288_p3)  ;;  %v3334_v25 = vld [vmem:[%s3248_s15 + $0x88] sm:$0xff] (!%p2288_p3) }
  0xaf   : > { %s2287_s21 = sshll.u32 %s610_s16, 1  ;;  %687 = vadd.xlane.f32.xlu0 (!%p2288_p3), %v686_v10  ;;  %v704_v23 = vadd.f32 (!%p2288_p3), %v3324_v21, %v3321_v20  ;;  %v3337_v26 = vld [vmem:[%s3248_s15 + $0x90] sm:$0xff] (!%p2288_p3)  ;;  %v3340_v27 = vld [vmem:[%s3248_s15 + $0x98] sm:$0xff] (!%p2288_p3)  ;;  %v707_v28 = vadd.f32 (!%p2288_p3), %v3334_v25, %v3331_v24  ;;  %v3347_v30 = vld [vmem:[%s3248_s15 + $0xa0] sm:$0xff] (!%p2288_p3) }
  0xb0   : > { %p612_p9 = scmp.lt.s32.totalorder %s2287_s21, 7  ;;  %693 = vadd.xlane.f32.xlu1 (!%p2288_p3), %v692_v11  ;;  %v710_v29 = vadd.f32 (!%p2288_p3), %v3340_v27, %v3337_v26  ;;  %v3350_v31 = vld [vmem:[%s3248_s15 + $0xa8] sm:$0xff] (!%p2288_p3)  ;;  %v3353_v32 = vld [vmem:[%s3248_s15 + $0xb0] sm:$0xff] (!%p2288_p3)  ;;  %v3356_v33 = vld [vmem:[%s3248_s15 + $0xb8] sm:$0xff] (!%p2288_p3) }
  0xb1   : > { %v713_v34 = vadd.f32 (!%p2288_p3), %v3350_v31, %v3347_v30  ;;  %v716_v35 = vadd.f32 (!%p2288_p3), %v3356_v33, %v3353_v32  ;;  %v3363_v36 = vld [vmem:[%s3248_s15 + $0xc0] sm:$0xff] (!%p2288_p3)  ;;  %v3366_v37 = vld [vmem:[%s3248_s15 + $0xc8] sm:$0xff] (!%p2288_p3) }
  0xb2   : > { %s3951_s21 = smov (!%p612_p9, %s2287_s21), 7  ;;  %v719_v38 = vadd.f32 (!%p2288_p3), %v3366_v37, %v3363_v36 }
  0xb3   : > { %s614_s10 = scalar_lea.vmem %s3885_s4, %s3951_s21  ;;  %696 = vadd.xlane.f32.xlu0 (!%p2288_p3), %v695_v16 }
  0xb4   : > { %699 = vadd.xlane.f32.xlu1 (!%p2288_p3), %v698_v17 }
  0xb7   : > { %702 = vadd.xlane.f32.xlu0 %v701_v22 }
  0xb8   : > { %705 = vadd.xlane.f32.xlu1 %v704_v23 }
  0xbb   : > { %708 = vadd.xlane.f32.xlu0 %v707_v28 }
  0xbc   : > { %711 = vadd.xlane.f32.xlu1 %v710_v29 }
  0xbf   : > { %714 = vadd.xlane.f32.xlu0 %v713_v34 }
  0xc0   : > { %717 = vadd.xlane.f32.xlu1 %v716_v35 }
  0xc3   : > { %720 = vadd.xlane.f32.xlu0 %v719_v38 }
 0x138   : > { %v685_v39 = vpop.xlane.xlu0 %684 }
 0x139   : > { %v723_v40 = vmul.f32 0.00390625, %v685_v39  ;;  %v691_v41 = vpop.xlane.xlu1 %690 }
 0x13a   : > { %v725_v42 = vmul.f32 0.00390625, %v691_v41 }
 0x13b   : > { %v3370_v43 = vsub.f32 %v657_v0, %v723_v40  ;;  %v3372_v44 = vsub.f32 %v658_v1, %v723_v40 }
 0x13c   : > { %v3374_v45 = vsub.f32 %v661_v2, %v725_v42  ;;  %v3376_v46 = vsub.f32 %v662_v4, %v725_v42  ;;  %v688_v47 = vpop.xlane.xlu0 %687 }
 0x13d   : > { %v724_v48 = vmul.f32 0.00390625, %v688_v47  ;;  %v694_v49 = vpop.xlane.xlu1 %693  ;;  %v762_v50 = vmul.f32 %v3370_v43, %v3370_v43  ;;  %v763_v51 = vmul.f32 %v3372_v44, %v3372_v44 }
 0x13e   : > { %v726_v52 = vmul.f32 0.00390625, %v694_v49  ;;  %v766_v53 = vmul.f32 %v3374_v45, %v3374_v45  ;;  %v767_v54 = vmul.f32 %v3376_v46, %v3376_v46 }
 0x13f   : > { %v3387_v55 = vsub.f32 %v3283_v5, %v724_v48  ;;  %v3390_v56 = vsub.f32 %v3286_v6, %v724_v48  ;;  %v788_v57 = vadd.f32 %v763_v51, %v762_v50 }
 0x140   : > { %v3393_v58 = vsub.f32 %v3289_v8, %v726_v52  ;;  %v3396_v59 = vsub.f32 %v3292_v9, %v726_v52  ;;  %v697_v60 = vpop.xlane.xlu0 %696  ;;  %v794_v63 = vadd.f32 %v767_v54, %v766_v53 }
 0x141   : > { %v727_v61 = vmul.f32 0.00390625, %v697_v60  ;;  %789 = vadd.xlane.f32.xlu1 %v788_v57  ;;  %v700_v62 = vpop.xlane.xlu1 %699  ;;  %v764_v0 = vmul.f32 %v3387_v55, %v3387_v55  ;;  %v765_v1 = vmul.f32 %v3390_v56, %v3390_v56 }
 0x142   : > { %v728_v2 = vmul.f32 0.00390625, %v700_v62  ;;  %v768_v3 = vmul.f32 %v3393_v58, %v3393_v58  ;;  %v769_v4 = vmul.f32 %v3396_v59, %v3396_v59 }
 0x143   : > { %v3407_v5 = vsub.f32 %v3299_v12, %v727_v61  ;;  %v3410_v6 = vsub.f32 %v3302_v13, %v727_v61  ;;  %v791_v7 = vadd.f32 %v765_v1, %v764_v0 }
 0x144   : > { %v3413_v8 = vsub.f32 %v3305_v14, %v728_v2  ;;  %v3416_v9 = vsub.f32 %v3308_v15, %v728_v2  ;;  %v703_v10 = vpop.xlane.xlu0 %702  ;;  %v797_v17 = vadd.f32 %v769_v4, %v768_v3 }
 0x145   : > { %v729_v11 = vmul.f32 0.00390625, %v703_v10  ;;  %795 = vadd.xlane.f32.xlu1 %v794_v63  ;;  %792 = vadd.xlane.f32.xlu0 %v791_v7  ;;  %v706_v16 = vpop.xlane.xlu1 %705  ;;  %v770_v12 = vmul.f32 %v3407_v5, %v3407_v5  ;;  %v771_v13 = vmul.f32 %v3410_v6, %v3410_v6 }
 0x146   : > { %v730_v22 = vmul.f32 0.00390625, %v706_v16  ;;  %v772_v14 = vmul.f32 %v3413_v8, %v3413_v8  ;;  %v773_v15 = vmul.f32 %v3416_v9, %v3416_v9 }
 0x147   : > { %v3427_v23 = vsub.f32 %v3315_v18, %v729_v11  ;;  %v3430_v28 = vsub.f32 %v3318_v19, %v729_v11  ;;  %v800_v29 = vadd.f32 %v771_v13, %v770_v12 }
 0x148   : > { %v3433_v34 = vsub.f32 %v3321_v20, %v730_v22  ;;  %v3436_v35 = vsub.f32 %v3324_v21, %v730_v22  ;;  %v709_v38 = vpop.xlane.xlu0 %708  ;;  %v803_v41 = vadd.f32 %v773_v15, %v772_v14  ;;  %v2937_v22 = vmov 0.0  }
 0x149   : > { %v731_v39 = vmul.f32 0.00390625, %v709_v38  ;;  %798 = vadd.xlane.f32.xlu0 %v797_v17  ;;  %801 = vadd.xlane.f32.xlu1 %v800_v29  ;;  %v712_v40 = vpop.xlane.xlu1 %711  ;;  %v774_v18 = vmul.f32 %v3427_v23, %v3427_v23  ;;  %v775_v19 = vmul.f32 %v3430_v28, %v3430_v28  ;;  %1061 = vst [vmem:[#allocation3] sm:$0xff] %v2937_v22  ;;  %1062 = vst [vmem:[#allocation3 + $0x8] sm:$0xff] %v2937_v22  ;;  %v894_v14 = vlaneseq }
 0x14a   : > { %v732_v42 = vmul.f32 0.00390625, %v712_v40  ;;  %v776_v20 = vmul.f32 %v3433_v34, %v3433_v34  ;;  %v777_v21 = vmul.f32 %v3436_v35, %v3436_v35  ;;  %1063 = vst [vmem:[#allocation3 + $0x10] sm:$0xff] %v2937_v22  ;;  %1064 = vst [vmem:[#allocation3 + $0x18] sm:$0xff] %v2937_v22 }
 0x14b   : > { %v3447_v47 = vsub.f32 %v3331_v24, %v731_v39  ;;  %v3450_v48 = vsub.f32 %v3334_v25, %v731_v39  ;;  %v806_v49 = vadd.f32 %v775_v19, %v774_v18  ;;  %1065 = vst [vmem:[#allocation3 + $0x20] sm:$0xff] %v2937_v22  ;;  %1066 = vst [vmem:[#allocation3 + $0x28] sm:$0xff] %v2937_v22 }
 0x14c   : > { %v3453_v50 = vsub.f32 %v3337_v26, %v732_v42  ;;  %v3456_v51 = vsub.f32 %v3340_v27, %v732_v42  ;;  %v715_v52 = vpop.xlane.xlu0 %714  ;;  %v809_v57 = vadd.f32 %v777_v21, %v776_v20  ;;  %1067 = vst [vmem:[#allocation3 + $0x30] sm:$0xff] %v2937_v22  ;;  %1068 = vst [vmem:[#allocation3 + $0x38] sm:$0xff] %v2937_v22 }
 0x14d   : > { %v733_v53 = vmul.f32 0.00390625, %v715_v52  ;;  %804 = vadd.xlane.f32.xlu0 %v803_v41  ;;  %807 = vadd.xlane.f32.xlu1 %v806_v49  ;;  %v718_v54 = vpop.xlane.xlu1 %717  ;;  %v778_v24 = vmul.f32 %v3447_v47, %v3447_v47  ;;  %v779_v25 = vmul.f32 %v3450_v48, %v3450_v48  ;;  %1069 = vst [vmem:[#allocation3 + $0x40] sm:$0xff] %v2937_v22  ;;  %1070 = vst [vmem:[#allocation3 + $0x48] sm:$0xff] %v2937_v22 }
 0x14e   : > { %v734_v60 = vmul.f32 0.00390625, %v718_v54  ;;  %v780_v26 = vmul.f32 %v3453_v50, %v3453_v50  ;;  %v781_v27 = vmul.f32 %v3456_v51, %v3456_v51  ;;  %1071 = vst [vmem:[#allocation3 + $0x50] sm:$0xff] %v2937_v22  ;;  %1072 = vst [vmem:[#allocation3 + $0x58] sm:$0xff] %v2937_v22  ;;  %v895_v41 = vshrl.u32 %v894_v14, 7  ;;  %v892_v54 = vld [vmem:[%s3916_s24] sm:$0x3] }
 0x14f   : > { %v3467_v61 = vsub.f32 %v3347_v30, %v733_v53  ;;  %v3470_v62 = vsub.f32 %v3350_v31, %v733_v53  ;;  %v812_v63 = vadd.f32 %v779_v25, %v778_v24  ;;  %1073 = vst [vmem:[#allocation3 + $0x60] sm:$0xff] %v2937_v22  ;;  %1074 = vst [vmem:[#allocation3 + $0x68] sm:$0xff] %v2937_v22 }
 0x150   : > { %v3473_v0 = vsub.f32 %v3353_v32, %v734_v60  ;;  %v3476_v1 = vsub.f32 %v3356_v33, %v734_v60  ;;  %v721_v2 = vpop.xlane.xlu0 %720  ;;  %v815_v4 = vadd.f32 %v781_v27, %v780_v26  ;;  %1075 = vst [vmem:[#allocation3 + $0x70] sm:$0xff] %v2937_v22  ;;  %1076 = vst [vmem:[#allocation3 + $0x78] sm:$0xff] %v2937_v22  ;;  %v896_v52 = vsub.s32 0, %v895_v41  ;;  %v930_v26 = vld [vmem:[%s3917_s13] sm:$0x3] }
 0x151   : > { %v735_v3 = vmul.f32 0.00390625, %v721_v2  ;;  %810 = vadd.xlane.f32.xlu0 %v809_v57  ;;  %813 = vadd.xlane.f32.xlu1 %v812_v63  ;;  %v782_v7 = vmul.f32 %v3467_v61, %v3467_v61  ;;  %v783_v30 = vmul.f32 %v3470_v62, %v3470_v62  ;;  %1077 = vst [vmem:[#allocation3 + $0x80] sm:$0xff] %v2937_v22  ;;  %1078 = vst [vmem:[#allocation3 + $0x88] sm:$0xff] %v2937_v22 }
 0x152   : > { %v784_v31 = vmul.f32 %v3473_v0, %v3473_v0  ;;  %v785_v32 = vmul.f32 %v3476_v1, %v3476_v1  ;;  %1079 = vst [vmem:[#allocation3 + $0x90] sm:$0xff] %v2937_v22  ;;  %1080 = vst [vmem:[#allocation3 + $0x98] sm:$0xff] %v2937_v22  ;;  %v900_v53 = vsub.s32 1, %v895_v41  ;;  %v3502_v2 = vrot.slane %v892_v54, %v896_v52 }
 0x153   : > { %v3487_v33 = vsub.f32 %v3363_v36, %v735_v3  ;;  %v3490_v10 = vsub.f32 %v3366_v37, %v735_v3  ;;  %v818_v11 = vadd.f32 %v783_v30, %v782_v7  ;;  %1081 = vst [vmem:[#allocation3 + $0xa0] sm:$0xff] %v2937_v22  ;;  %1082 = vst [vmem:[#allocation3 + $0xa8] sm:$0xff] %v2937_v22 }
 0x154   : > { %v821_v16 = vadd.f32 %v785_v32, %v784_v31  ;;  %1083 = vst [vmem:[#allocation3 + $0xb0] sm:$0xff] %v2937_v22  ;;  %1084 = vst [vmem:[#allocation3 + $0xb8] sm:$0xff] %v2937_v22  ;;  %v3504_v3 = vrot.slane %v892_v54, %v900_v53  ;;  %v3506_v31 = vrot.slane %v930_v26, %v896_v52 }
 0x155   : > { %816 = vadd.xlane.f32.xlu0 %v815_v4  ;;  %819 = vadd.xlane.f32.xlu1 %v818_v11  ;;  %v786_v17 = vmul.f32 %v3487_v33, %v3487_v33  ;;  %v787_v12 = vmul.f32 %v3490_v10, %v3490_v10  ;;  %1085 = vst [vmem:[#allocation3 + $0xc0] sm:$0xff] %v2937_v22  ;;  %1086 = vst [vmem:[#allocation3 + $0xc8] sm:$0xff] %v2937_v22 }
 0x156   : > { %v3508_v32 = vrot.slane %v930_v26, %v900_v53 }
 0x157   : > { %v824_v13 = vadd.f32 %v787_v12, %v786_v17 }
 0x159   : > { %822 = vadd.xlane.f32.xlu0 %v821_v16  ;;  %825 = vadd.xlane.f32.xlu1 %v824_v13 }
 0x1ce   : > { %v790_v36 = vpop.xlane.xlu1 %789 }
 0x1cf   : > { %v827_v37 = vmul.f32 0.00390625, %v790_v36 }
 0x1d1   : > { %v840_v15 = vadd.f32 1e-05, %v827_v37 }
 0x1d2   : > { %v796_v29 = vpop.xlane.xlu1 %795  ;;  %v793_v38 = vpop.xlane.xlu0 %792 }
 0x1d3   : > { %2523 = vrsqrt.f32 %v840_v15  ;;  %v829_v39 = vmul.f32 0.00390625, %v796_v29  ;;  %v828_v40 = vmul.f32 0.00390625, %v793_v38 }
 0x1d5   : > { %v842_v18 = vadd.f32 1e-05, %v829_v39  ;;  %v841_v19 = vadd.f32 1e-05, %v828_v40 }
 0x1d6   : > { %v802_v42 = vpop.xlane.xlu1 %801  ;;  %v799_v20 = vpop.xlane.xlu0 %798 }
 0x1d7   : > { %2525 = vrsqrt.f32 %v842_v18  ;;  %v831_v21 = vmul.f32 0.00390625, %v802_v42  ;;  %v830_v49 = vmul.f32 0.00390625, %v799_v20 }
 0x1d8   : > { %2527 = vrsqrt.f32 %v841_v19 }
 0x1d9   : > { %v844_v57 = vadd.f32 1e-05, %v831_v21  ;;  %v843_v24 = vadd.f32 1e-05, %v830_v49 }
 0x1da   : > { %v808_v25 = vpop.xlane.xlu1 %807  ;;  %v805_v60 = vpop.xlane.xlu0 %804 }
 0x1db   : > { %2529 = vrsqrt.f32 %v844_v57  ;;  %v833_v27 = vmul.f32 0.00390625, %v808_v25  ;;  %v832_v63 = vmul.f32 0.00390625, %v805_v60 }
 0x1dc   : > { %2531 = vrsqrt.f32 %v843_v24 }
 0x1dd   : > { %v2524_v4 = vpop.eup %2523  ;;  %v846_v7 = vadd.f32 1e-05, %v833_v27  ;;  %v845_v30 = vadd.f32 1e-05, %v832_v63 }
 0x1de   : > { %v866_v11 = vmul.f32 %v2524_v4, %v3370_v43  ;;  %v867_v16 = vmul.f32 %v2524_v4, %v3372_v44  ;;  %v814_v17 = vpop.xlane.xlu1 %813  ;;  %v811_v12 = vpop.xlane.xlu0 %810 }
 0x1df   : > { %2533 = vrsqrt.f32 %v846_v7  ;;  %v835_v13 = vmul.f32 0.00390625, %v814_v17  ;;  %v834_v22 = vmul.f32 0.00390625, %v811_v12 }
 0x1e0   : > { %v904_v36 = vmul.f32 %v3502_v2, %v866_v11  ;;  %v905_v37 = vmul.f32 %v3504_v3, %v867_v16  ;;  %2535 = vrsqrt.f32 %v845_v30 }
 0x1e1   : > { %v2526_v14 = vpop.eup %2525  ;;  %v848_v15 = vadd.f32 1e-05, %v835_v13  ;;  %v847_v29 = vadd.f32 1e-05, %v834_v22 }
 0x1e2   : > { %v2528_v38 = vpop.eup %2527  ;;  %v942_v39 = vadd.f32 %v3506_v31, %v904_v36  ;;  %v943_v43 = vadd.f32 %v3508_v32, %v905_v37  ;;  %v870_v44 = vmul.f32 %v2526_v14, %v3374_v45  ;;  %v871_v40 = vmul.f32 %v2526_v14, %v3376_v46  ;;  %v820_v41 = vpop.xlane.xlu1 %819 }
 0x1e3   : > { %v817_v18 = vpop.xlane.xlu0 %816  ;;  %v868_v19 = vmul.f32 %v2528_v38, %v3387_v55  ;;  %v869_v42 = vmul.f32 %v2528_v38, %v3390_v56  ;;  %2537 = vrsqrt.f32 %v848_v15  ;;  %v837_v20 = vmul.f32 0.00390625, %v820_v41 }
 0x1e4   : > { %v2396_v21 = vpack.c.bf16 %v943_v43, %v942_v39  ;;  %v908_v49 = vmul.f32 %v3502_v2, %v870_v44  ;;  %v909_v52 = vmul.f32 %v3504_v3, %v871_v40  ;;  %2539 = vrsqrt.f32 %v847_v29 }
 0x1e5   : > { %v2530_v53 = vpop.eup %2529  ;;  %v906_v54 = vmul.f32 %v3502_v2, %v868_v19  ;;  %v907_v45 = vmul.f32 %v3504_v3, %v869_v42  ;;  %v850_v46 = vadd.f32 1e-05, %v837_v20  ;;  %v836_v57 = vmul.f32 0.00390625, %v817_v18 }
 0x1e6   : > { %v2532_v24 = vpop.eup %2531  ;;  %1048 = vst [vmem:[#allocation2] sm:$0xff] %v2396_v21  ;;  %v946_v55 = vadd.f32 %v3506_v31, %v908_v49  ;;  %v947_v56 = vadd.f32 %v3508_v32, %v909_v52  ;;  %v874_v25 = vmul.f32 %v2530_v53, %v3407_v5  ;;  %v875_v60 = vmul.f32 %v2530_v53, %v3410_v6  ;;  %v826_v37 = vpop.xlane.xlu1 %825 }
 0x1e7   : > { %v944_v26 = vadd.f32 %v3506_v31, %v906_v54  ;;  %v945_v27 = vadd.f32 %v3508_v32, %v907_v45  ;;  %v872_v63 = vmul.f32 %v2532_v24, %v3393_v58  ;;  %v873_v4 = vmul.f32 %v2532_v24, %v3396_v59  ;;  %v823_v21 = vpop.xlane.xlu0 %822 }
 0x1e8   : > { %v2398_v7 = vpack.c.bf16 %v947_v56, %v946_v55  ;;  %v912_v30 = vmul.f32 %v3502_v2, %v874_v25  ;;  %v913_v11 = vmul.f32 %v3504_v3, %v875_v60  ;;  %2541 = vrsqrt.f32 %v850_v46 }
 0x1e9   : > { %v2534_v16 = vpop.eup %2533  ;;  %v2397_v17 = vpack.c.bf16 %v945_v27, %v944_v26  ;;  %v910_v5 = vmul.f32 %v3502_v2, %v872_v63  ;;  %v911_v6 = vmul.f32 %v3504_v3, %v873_v4  ;;  %v849_v12 = vadd.f32 1e-05, %v836_v57 }
 0x1ea   : > { %v2536_v13 = vpop.eup %2535  ;;  %1050 = vst [vmem:[#allocation2 + $0x10] sm:$0xff] %v2398_v7  ;;  %v950_v22 = vadd.f32 %v3506_v31, %v912_v30  ;;  %v951_v58 = vadd.f32 %v3508_v32, %v913_v11  ;;  %v878_v59 = vmul.f32 %v2534_v16, %v3427_v23  ;;  %v879_v36 = vmul.f32 %v2534_v16, %v3430_v28 }
 0x1eb   : > { %1049 = vst [vmem:[#allocation2 + $0x8] sm:$0xff] %v2397_v17  ;;  %v948_v14 = vadd.f32 %v3506_v31, %v910_v5  ;;  %v949_v15 = vadd.f32 %v3508_v32, %v911_v6  ;;  %v876_v29 = vmul.f32 %v2536_v13, %v3413_v8  ;;  %v877_v38 = vmul.f32 %v2536_v13, %v3416_v9 }
 0x1ec   : > { %v2400_v39 = vpack.c.bf16 %v951_v58, %v950_v22  ;;  %v916_v43 = vmul.f32 %v3502_v2, %v878_v59  ;;  %v917_v44 = vmul.f32 %v3504_v3, %v879_v36  ;;  %2543 = vrsqrt.f32 %v849_v12 }
 0x1ed   : > { %v2538_v40 = vpop.eup %2537  ;;  %v2399_v23 = vpack.c.bf16 %v949_v15, %v948_v14  ;;  %v914_v28 = vmul.f32 %v3502_v2, %v876_v29  ;;  %v915_v41 = vmul.f32 %v3504_v3, %v877_v38  ;;  %v839_v18 = vmul.f32 0.00390625, %v826_v37 }
 0x1ee   : > { %v2540_v19 = vpop.eup %2539  ;;  %1052 = vst [vmem:[#allocation2 + $0x20] sm:$0xff] %v2400_v39  ;;  %v954_v42 = vadd.f32 %v3506_v31, %v916_v43  ;;  %v955_v8 = vadd.f32 %v3508_v32, %v917_v44  ;;  %v882_v9 = vmul.f32 %v2538_v40, %v3447_v47  ;;  %v883_v20 = vmul.f32 %v2538_v40, %v3450_v48 }
 0x1ef   : > { %1051 = vst [vmem:[#allocation2 + $0x18] sm:$0xff] %v2399_v23  ;;  %v952_v49 = vadd.f32 %v3506_v31, %v914_v28  ;;  %v953_v52 = vadd.f32 %v3508_v32, %v915_v41  ;;  %v880_v53 = vmul.f32 %v2540_v19, %v3433_v34  ;;  %v881_v54 = vmul.f32 %v2540_v19, %v3436_v35 }
 0x1f0   : > { %v2402_v45 = vpack.c.bf16 %v955_v8, %v954_v42  ;;  %v920_v46 = vmul.f32 %v3502_v2, %v882_v9  ;;  %v921_v57 = vmul.f32 %v3504_v3, %v883_v20  ;;  %v852_v24 = vadd.f32 1e-05, %v839_v18 }
 0x1f1   : > { %v2401_v55 = vpack.c.bf16 %v953_v52, %v952_v49  ;;  %v918_v47 = vmul.f32 %v3502_v2, %v880_v53  ;;  %v919_v48 = vmul.f32 %v3504_v3, %v881_v54  ;;  %v838_v56 = vmul.f32 0.00390625, %v823_v21 }
 0x1f2   : > { %v2542_v25 = vpop.eup %2541  ;;  %1054 = vst [vmem:[#allocation2 + $0x30] sm:$0xff] %v2402_v45  ;;  %v958_v60 = vadd.f32 %v3506_v31, %v920_v46  ;;  %v959_v34 = vadd.f32 %v3508_v32, %v921_v57  ;;  %2545 = vrsqrt.f32 %v852_v24 }
 0x1f3   : > { %1053 = vst [vmem:[#allocation2 + $0x28] sm:$0xff] %v2401_v55  ;;  %v956_v35 = vadd.f32 %v3506_v31, %v918_v47  ;;  %v957_v26 = vadd.f32 %v3508_v32, %v919_v48  ;;  %v886_v27 = vmul.f32 %v2542_v25, %v3467_v61  ;;  %v887_v63 = vmul.f32 %v2542_v25, %v3470_v62 }
 0x1f4   : > { %v2404_v4 = vpack.c.bf16 %v959_v34, %v958_v60  ;;  %v851_v7 = vadd.f32 1e-05, %v838_v56 }
 0x1f5   : > { %v2403_v30 = vpack.c.bf16 %v957_v26, %v956_v35  ;;  %v924_v11 = vmul.f32 %v3502_v2, %v886_v27  ;;  %v925_v16 = vmul.f32 %v3504_v3, %v887_v63 }
 0x1f6   : > { %v2544_v17 = vpop.eup %2543  ;;  %1056 = vst [vmem:[#allocation2 + $0x40] sm:$0xff] %v2404_v4  ;;  %2547 = vrsqrt.f32 %v851_v7 }
 0x1f7   : > { %1055 = vst [vmem:[#allocation2 + $0x38] sm:$0xff] %v2403_v30  ;;  %v962_v5 = vadd.f32 %v3506_v31, %v924_v11  ;;  %v963_v6 = vadd.f32 %v3508_v32, %v925_v16  ;;  %v884_v12 = vmul.f32 %v2544_v17, %v3453_v50  ;;  %v885_v61 = vmul.f32 %v2544_v17, %v3456_v51 }
 0x1f9   : > { %v2406_v62 = vpack.c.bf16 %v963_v6, %v962_v5  ;;  %v922_v13 = vmul.f32 %v3502_v2, %v884_v12  ;;  %v923_v22 = vmul.f32 %v3504_v3, %v885_v61 }
 0x1fb   : > { %1058 = vst [vmem:[#allocation2 + $0x50] sm:$0xff] %v2406_v62  ;;  %v960_v58 = vadd.f32 %v3506_v31, %v922_v13  ;;  %v961_v59 = vadd.f32 %v3508_v32, %v923_v22 }
 0x1fc   : > { %v2546_v36 = vpop.eup %2545 }
 0x1fd   : > { %v2405_v37 = vpack.c.bf16 %v961_v59, %v960_v58  ;;  %v890_v14 = vmul.f32 %v2546_v36, %v3487_v33  ;;  %v891_v15 = vmul.f32 %v2546_v36, %v3490_v10 }
 0x1ff   : > { %1057 = vst [vmem:[#allocation2 + $0x48] sm:$0xff] %v2405_v37  ;;  %v928_v50 = vmul.f32 %v3502_v2, %v890_v14  ;;  %v929_v51 = vmul.f32 %v3504_v3, %v891_v15 }
 0x200   : > { %v2548_v29 = vpop.eup %2547 }
 0x201   : > { %v966_v38 = vadd.f32 %v3506_v31, %v928_v50  ;;  %v967_v39 = vadd.f32 %v3508_v32, %v929_v51  ;;  %v888_v43 = vmul.f32 %v2548_v29, %v3473_v0  ;;  %v889_v44 = vmul.f32 %v2548_v29, %v3476_v1 }
 0x203   : > { %v2408_v40 = vpack.c.bf16 %v967_v39, %v966_v38  ;;  %v926_v23 = vmul.f32 %v3502_v2, %v888_v43  ;;  %v927_v33 = vmul.f32 %v3504_v3, %v889_v44 }
 0x205   : > { %1060 = vst [vmem:[#allocation2 + $0x60] sm:$0xff] %v2408_v40  ;;  %v964_v10 = vadd.f32 %v3506_v31, %v926_v23  ;;  %v965_v28 = vadd.f32 %v3508_v32, %v927_v33 }
 0x207   : > { %v2407_v41 = vpack.c.bf16 %v965_v28, %v964_v10 }
 0x209   : > { %1059 = vst [vmem:[#allocation2 + $0x58] sm:$0xff] %v2407_v41 }
 0x20a PF: > { %v2549_v0 = vld [vmem:[%s3256_s22 + $0x4] ss:$8 sps:$4 sm:$0xff]   ;;  %v2551_v1 = vld [vmem:[%s3256_s22] ss:$8 sps:$4 sm:$0xff]   ;;  %v2552_v2 = vld [vmem:[%s3256_s22 + $0x14] ss:$8 sps:$4 sm:$0xff]  }
 0x20b   : > { %1371 = vmatprep.subr.bf16.mxu0 %v2549_v0  ;;  %v2554_v3 = vld [vmem:[%s3256_s22 + $0x10] ss:$8 sps:$4 sm:$0xff]   ;;  %v2555_v31 = vld [vmem:[%s3256_s22 + $0x24] ss:$8 sps:$4 sm:$0xff]   ;;  %v2557_v32 = vld [vmem:[%s3256_s22 + $0x20] ss:$8 sps:$4 sm:$0xff]  }
 0x20c   : > { %1372 = vmatpush1.bf16.msra.mxu0 %v2551_v1  ;;  %v2558_v18 = vld [vmem:[%s3256_s22 + $0x34] ss:$8 sps:$4 sm:$0xff]   ;;  %v2560_v19 = vld [vmem:[%s3256_s22 + $0x30] ss:$8 sps:$4 sm:$0xff]   ;;  %v2561_v42 = vld [vmem:[%s3256_s22 + $0x44] ss:$8 sps:$4 sm:$0xff]  }
 0x20d   : > { %1373 = vmatprep.subr.bf16.mxu0 %v2552_v2  ;;  %v2563_v8 = vld [vmem:[%s3256_s22 + $0x40] ss:$8 sps:$4 sm:$0xff]   ;;  %v2564_v9 = vld [vmem:[%s3256_s22 + $0x54] ss:$8 sps:$4 sm:$0xff]   ;;  %v2566_v20 = vld [vmem:[%s3256_s22 + $0x50] ss:$8 sps:$4 sm:$0xff]  }
 0x20e   : > { %v2567_v21 = vld [vmem:[%s3256_s22 + $0x64] ss:$8 sps:$4 sm:$0xff]   ;;  %v2569_v52 = vld [vmem:[%s3256_s22 + $0x60] ss:$8 sps:$4 sm:$0xff]   ;;  %v2570_v53 = vld [vmem:[%s3256_s22 + $0x74] ss:$8 sps:$4 sm:$0xff]  }
 0x20f   : > { %v2599_v49 = vld [vmem:[#allocation2 + $0x4] ss:$8 sps:$4 sm:$0xff]   ;;  %v2572_v54 = vld [vmem:[%s3256_s22 + $0x70] ss:$8 sps:$4 sm:$0xff]   ;;  %v2575_v46 = vld [vmem:[%s3256_s22 + $0x80] ss:$8 sps:$4 sm:$0xff]  }
 0x210   : > { %1374 = vmatpush1.bf16.msra.mxu0 %v2554_v3  ;;  %1403 = vmatprep.mubr.bf16.mxu0 %v2599_v49  ;;  %v2573_v45 = vld [vmem:[%s3256_s22 + $0x84] ss:$8 sps:$4 sm:$0xff]   ;;  %v2619_v24 = vld [vmem:[%s3273_s1] ss:$8 sps:$4 sm:$0xff]   ;;  %v2620_v55 = vld [vmem:[%s3273_s1 + $0x14] ss:$8 sps:$4 sm:$0xff]  }
 0x211   : > { %1375 = vmatprep.subr.bf16.mxu0 %v2555_v31  ;;  %v2617_v57 = vld [vmem:[%s3273_s1 + $0x4] ss:$8 sps:$4 sm:$0xff]   ;;  %v2576_v47 = vld [vmem:[%s3256_s22 + $0x94] ss:$8 sps:$4 sm:$0xff]   ;;  %v2622_v48 = vld [vmem:[%s3273_s1 + $0x10] ss:$8 sps:$4 sm:$0xff]  }
 0x212   : > { %1834 = vmatprep.subr.bf16.mxu1 %v2617_v57  ;;  %v2623_v56 = vld [vmem:[%s3273_s1 + $0x24] ss:$8 sps:$4 sm:$0xff]   ;;  %v2578_v25 = vld [vmem:[%s3256_s22 + $0x90] ss:$8 sps:$4 sm:$0xff]   ;;  %v2625_v34 = vld [vmem:[%s3273_s1 + $0x20] ss:$8 sps:$4 sm:$0xff]  }
 0x213   : > { %1835 = vmatpush1.bf16.msra.mxu1 %v2619_v24  ;;  %v2579_v60 = vld [vmem:[%s3256_s22 + $0xa4] ss:$8 sps:$4 sm:$0xff]   ;;  %v2626_v35 = vld [vmem:[%s3273_s1 + $0x34] ss:$8 sps:$4 sm:$0xff]   ;;  %v2581_v26 = vld [vmem:[%s3256_s22 + $0xa0] ss:$8 sps:$4 sm:$0xff]  }
 0x214   : > { %1376 = vmatpush1.bf16.msra.mxu0 %v2557_v32  ;;  %1836 = vmatprep.subr.bf16.mxu1 %v2620_v55  ;;  %v2582_v27 = vld [vmem:[%s3256_s22 + $0xb4] ss:$8 sps:$4 sm:$0xff]   ;;  %v2584_v63 = vld [vmem:[%s3256_s22 + $0xb0] ss:$8 sps:$4 sm:$0xff]   ;;  %v2585_v7 = vld [vmem:[%s3256_s22 + $0xc4] ss:$8 sps:$4 sm:$0xff]  }
 0x215   : > { %1377 = vmatprep.subr.bf16.mxu0 %v2558_v18  ;;  %v2628_v4 = vld [vmem:[%s3273_s1 + $0x30] ss:$8 sps:$4 sm:$0xff]   ;;  %v2629_v30 = vld [vmem:[%s3273_s1 + $0x44] ss:$8 sps:$4 sm:$0xff]   ;;  %v2631_v11 = vld [vmem:[%s3273_s1 + $0x40] ss:$8 sps:$4 sm:$0xff]  }
 0x216   : > { %v2632_v16 = vld [vmem:[%s3273_s1 + $0x54] ss:$8 sps:$4 sm:$0xff]   ;;  %v2587_v17 = vld [vmem:[%s3256_s22 + $0xc0] ss:$8 sps:$4 sm:$0xff]   ;;  %v2634_v6 = vld [vmem:[%s3273_s1 + $0x50] ss:$8 sps:$4 sm:$0xff]  }
 0x217   : > { %1837 = vmatpush1.bf16.msra.mxu1 %v2622_v48  ;;  %v2588_v5 = vld [vmem:[%s3256_s22 + $0xd4] ss:$8 sps:$4 sm:$0xff]   ;;  %v2635_v12 = vld [vmem:[%s3273_s1 + $0x64] ss:$8 sps:$4 sm:$0xff]   ;;  %v2590_v61 = vld [vmem:[%s3256_s22 + $0xd0] ss:$8 sps:$4 sm:$0xff]  }
 0x218   : > { %1378 = vmatpush1.bf16.msra.mxu0 %v2560_v19  ;;  %1838 = vmatprep.subr.bf16.mxu1 %v2623_v56  ;;  %v2591_v62 = vld [vmem:[%s3256_s22 + $0xe4] ss:$8 sps:$4 sm:$0xff]   ;;  %v2637_v13 = vld [vmem:[%s3273_s1 + $0x60] ss:$8 sps:$4 sm:$0xff]   ;;  %v2638_v22 = vld [vmem:[%s3273_s1 + $0x74] ss:$8 sps:$4 sm:$0xff]  }
 0x219   : > { %1379 = vmatprep.subr.bf16.mxu0 %v2561_v42  ;;  %v2593_v58 = vld [vmem:[%s3256_s22 + $0xe0] ss:$8 sps:$4 sm:$0xff]   ;;  %v2594_v59 = vld [vmem:[%s3256_s22 + $0xf4] ss:$8 sps:$4 sm:$0xff]   ;;  %v2640_v36 = vld [vmem:[%s3273_s1 + $0x70] ss:$8 sps:$4 sm:$0xff]  }
 0x21a   : > { %v2641_v37 = vld [vmem:[%s3273_s1 + $0x84] ss:$8 sps:$4 sm:$0xff]   ;;  %v2596_v14 = vld [vmem:[%s3256_s22 + $0xf0] ss:$8 sps:$4 sm:$0xff]   ;;  %v2643_v15 = vld [vmem:[%s3273_s1 + $0x80] ss:$8 sps:$4 sm:$0xff]  }
 0x21b   : > { %1839 = vmatpush1.bf16.msra.mxu1 %v2625_v34  ;;  %v2597_v50 = vld [vmem:[#allocation2] ss:$8 sps:$4 sm:$0xff]   ;;  %v2644_v51 = vld [vmem:[%s3273_s1 + $0x94] ss:$8 sps:$4 sm:$0xff]   ;;  %v2602_v39 = vld [vmem:[#allocation2 + $0x10] ss:$8 sps:$4 sm:$0xff]  }
 0x21c   : > { %1380 = vmatpush1.bf16.msra.mxu0 %v2563_v8  ;;  %1840 = vmatprep.subr.bf16.mxu1 %v2626_v35  ;;  %v2600_v29 = vld [vmem:[#allocation2 + $0x14] ss:$8 sps:$4 sm:$0xff]   ;;  %v2646_v38 = vld [vmem:[%s3273_s1 + $0x90] ss:$8 sps:$4 sm:$0xff]   ;;  %v2603_v43 = vld [vmem:[#allocation2 + $0x24] ss:$8 sps:$4 sm:$0xff]  }
 0x21d   : > { %1381 = vmatprep.subr.bf16.mxu0 %v2564_v9  ;;  %v2605_v44 = vld [vmem:[#allocation2 + $0x20] ss:$8 sps:$4 sm:$0xff]   ;;  %v2606_v40 = vld [vmem:[#allocation2 + $0x34] ss:$8 sps:$4 sm:$0xff]   ;;  %v2608_v23 = vld [vmem:[#allocation2 + $0x30] ss:$8 sps:$4 sm:$0xff]  }
 0x21e   : > { %v2609_v33 = vld [vmem:[#allocation2 + $0x44] ss:$8 sps:$4 sm:$0xff]   ;;  %v2611_v10 = vld [vmem:[#allocation2 + $0x40] ss:$8 sps:$4 sm:$0xff]   ;;  %v2612_v28 = vld [vmem:[#allocation2 + $0x54] ss:$8 sps:$4 sm:$0xff]  }
 0x21f   : > { %1841 = vmatpush1.bf16.msra.mxu1 %v2628_v4  ;;  %v1099_v41 = vld [vmem:[#allocation2 + $0x60] sm:$0xff]  ;;  %v2614_v0 = vld [vmem:[#allocation2 + $0x50] ss:$8 sps:$4 sm:$0xff]   ;;  %v2650_v32 = vld [vmem:[%s3273_s1 + $0xb4] ss:$8 sps:$4 sm:$0xff]   ;;  %p2380_p8 = scmp.ne.s32.totalorder %s2911_s30, 3 }
 0x220   : > { %1382 = vmatpush1.bf16.msra.mxu0 %v2566_v20  ;;  %1842 = vmatprep.subr.bf16.mxu1 %v2629_v30  ;;  %v2315_v1 = vcombine.high %v1099_v41, %v1099_v41  ;;  %v2314_v2 = vcombine.low %v1099_v41, %v1099_v41  ;;  %v2647_v3 = vld [vmem:[%s3273_s1 + $0xa4] ss:$8 sps:$4 sm:$0xff]   ;;  %v2649_v31 = vld [vmem:[%s3273_s1 + $0xa0] ss:$8 sps:$4 sm:$0xff]   ;;  %v2652_v18 = vld [vmem:[%s3273_s1 + $0xb0] ss:$8 sps:$4 sm:$0xff]  }
 0x221   : > { %1383 = vmatprep.subr.bf16.mxu0 %v2567_v21  ;;  %v2653_v19 = vld [vmem:[%s3273_s1 + $0xc4] ss:$8 sps:$4 sm:$0xff]   ;;  %v2655_v42 = vld [vmem:[%s3273_s1 + $0xc0] ss:$8 sps:$4 sm:$0xff]   ;;  %v2656_v8 = vld [vmem:[%s3273_s1 + $0xd4] ss:$8 sps:$4 sm:$0xff]  }
 0x222   : > { %v2658_v9 = vld [vmem:[%s3273_s1 + $0xd0] ss:$8 sps:$4 sm:$0xff]   ;;  %v2659_v20 = vld [vmem:[%s3273_s1 + $0xe4] ss:$8 sps:$4 sm:$0xff]   ;;  %v2661_v21 = vld [vmem:[%s3273_s1 + $0xe0] ss:$8 sps:$4 sm:$0xff]  }
 0x223   : > { %1843 = vmatpush1.bf16.msra.mxu1 %v2631_v11  ;;  %v2662_v49 = vld [vmem:[%s3273_s1 + $0xf4] ss:$8 sps:$4 sm:$0xff]   ;;  %s3918_s17 = sld [smem:[#allocation24_spill]] (!%p2380_p8) }
 0x224   : > { %1384 = vmatpush1.bf16.msra.mxu0 %v2569_v52  ;;  %1844 = vmatprep.subr.bf16.mxu1 %v2632_v16  ;;  %v2664_v52 = vld [vmem:[%s3273_s1 + $0xf0] ss:$8 sps:$4 sm:$0xff]  }
 0x225   : > { %1385 = vmatprep.subr.bf16.mxu0 %v2570_v53  ;;  %v1134_v53 = vlaneseq }
 0x227   : > { %1845 = vmatpush1.bf16.msra.mxu1 %v2634_v6 }
 0x228   : > { %1386 = vmatpush1.bf16.msra.mxu0 %v2572_v54  ;;  %1846 = vmatprep.subr.bf16.mxu1 %v2635_v12  ;;  %v3652_v54 = vshrl.u32 %v1134_v53, 7 }
 0x229   : > { %1387 = vmatprep.subr.bf16.mxu0 %v2573_v45 }
 0x22a   : > { %v1136_v45 = vsub.s32 0, %v3652_v54  ;;  %v1140_v57 = vsub.s32 1, %v3652_v54 }
 0x22b   : > { %1847 = vmatpush1.bf16.msra.mxu1 %v2637_v13 }
 0x22c   : > { %1388 = vmatpush1.bf16.msra.mxu0 %v2575_v46  ;;  %1848 = vmatprep.subr.bf16.mxu1 %v2638_v22  ;;  %v1132_v46 = vld [vmem:[%s614_s10] sm:$0x3] }
 0x22d   : > { %1389 = vmatprep.subr.bf16.mxu0 %v2576_v47  ;;  %v3663_v24 = vrot.slane %v1132_v46, %v1136_v45  ;;  %v3667_v55 = vrot.slane %v1132_v46, %v1140_v57 }
 0x22f   : > { %1849 = vmatpush1.bf16.msra.mxu1 %v2640_v36 }
 0x230   : > { %1390 = vmatpush1.bf16.msra.mxu0 %v2578_v25  ;;  %1850 = vmatprep.subr.bf16.mxu1 %v2641_v37 }
 0x231   : > { %1391 = vmatprep.subr.bf16.mxu0 %v2579_v60 }
 0x233   : > { %1851 = vmatpush1.bf16.msra.mxu1 %v2643_v15 }
 0x234   : > { %1392 = vmatpush1.bf16.msra.mxu0 %v2581_v26  ;;  %1852 = vmatprep.subr.bf16.mxu1 %v2644_v51 }
 0x235   : > { %1393 = vmatprep.subr.bf16.mxu0 %v2582_v27 }
 0x237   : > { %1853 = vmatpush1.bf16.msra.mxu1 %v2646_v38 }
 0x238   : > { %1394 = vmatpush1.bf16.msra.mxu0 %v2584_v63  ;;  %1854 = vmatprep.subr.bf16.mxu1 %v2647_v3 }
 0x239   : > { %1395 = vmatprep.subr.bf16.mxu0 %v2585_v7 }
 0x23b   : > { %1855 = vmatpush1.bf16.msra.mxu1 %v2649_v31 }
 0x23c   : > { %1396 = vmatpush1.bf16.msra.mxu0 %v2587_v17  ;;  %1856 = vmatprep.subr.bf16.mxu1 %v2650_v32 }
 0x23d   : > { %1397 = vmatprep.subr.bf16.mxu0 %v2588_v5 }
 0x23f   : > { %1857 = vmatpush1.bf16.msra.mxu1 %v2652_v18 }
 0x240   : > { %1398 = vmatpush1.bf16.msra.mxu0 %v2590_v61  ;;  %1858 = vmatprep.subr.bf16.mxu1 %v2653_v19 }
 0x241   : > { %1399 = vmatprep.subr.bf16.mxu0 %v2591_v62 }
 0x243   : > { %1859 = vmatpush1.bf16.msra.mxu1 %v2655_v42 }
 0x244   : > { %1400 = vmatpush1.bf16.msra.mxu0 %v2593_v58  ;;  %1860 = vmatprep.subr.bf16.mxu1 %v2656_v8 }
 0x245   : > { %1401 = vmatprep.subr.bf16.mxu0 %v2594_v59 }
 0x247   : > { %1861 = vmatpush1.bf16.msra.mxu1 %v2658_v9 }
 0x248   : > { %1402 = vmatpush1.bf16.msra.mxu0 %v2596_v14  ;;  %1862 = vmatprep.subr.bf16.mxu1 %v2659_v20 }
 0x24b   : > { %1404 = vmatmul.mubr.bf16.vlgmr.msra.gmra.mrb[0].mxu0 %v2597_v50  ;;  %1863 = vmatpush1.bf16.msra.mxu1 %v2661_v21 }
 0x24c   : > { %1413 = vmatprep.mubr.bf16.mxu0 %v2600_v29  ;;  %1864 = vmatprep.subr.bf16.mxu1 %v2662_v49 }
 0x24f   : > { %1865 = vmatpush1.bf16.msra.mxu1 %v2664_v52 }
 0x253   : > { %1414 = vmatmul.mubr.bf16.gmra.mrb[4].mxu0 %v2602_v39 }
 0x254   : > { %1423 = vmatprep.mubr.bf16.mxu0 %v2603_v43 }
 0x25b   : > { %1424 = vmatmul.mubr.bf16.gmra.mrb[8].mxu0 %v2605_v44 }
 0x25c   : > { %1433 = vmatprep.mubr.bf16.mxu0 %v2606_v40 }
 0x263   : > { %1434 = vmatmul.mubr.bf16.gmra.mrb[12].mxu0 %v2608_v23 }
 0x264   : > { %1443 = vmatprep.mubr.bf16.mxu0 %v2609_v33 }
 0x26b   : > { %1444 = vmatmul.mubr.bf16.gmra.mrb[16].mxu0 %v2611_v10 }
 0x26c   : > { %1453 = vmatprep.mubr.bf16.mxu0 %v2612_v28 }
 0x273   : > { %1454 = vmatmul.mubr.bf16.gmra.mrb[20].mxu0 %v2614_v0 }
 0x274   : > { %1463 = vmatprep.mubr.bf16.mxu0 %v2315_v1 }
 0x27b   : > { %1464 = vmatmul.mubr.bf16.gmra.mrb[24].mxu0 %v2314_v2 }
 0x31e   : > { %v1405_v47 = vpop.f32.mrb[0].mxu0 }
 0x31f   : > { %v1406_v48 = vadd.f32 %v1405_v47, %v3663_v24  ;;  %v1407_v56 = vpop.f32.mrb[1].mxu0 }
 0x320   : > { %v1408_v25 = vadd.f32 %v1407_v56, %v3667_v55  ;;  %v1409_v60 = vpop.f32.mrb[2].mxu0 }
 0x321   : > { %v1498_v34 = vmul.f32 0.70710677, %v1406_v48  ;;  %v1410_v35 = vadd.f32 %v1409_v60, %v3663_v24  ;;  %v1411_v26 = vpop.f32.mrb[3].mxu0  ;;  %v1472_v15 = vmul.f32 0.5, %v1406_v48 }
 0x322   : > { %v1499_v27 = vmul.f32 0.70710677, %v1408_v25  ;;  %v1412_v63 = vadd.f32 %v1411_v26, %v3667_v55  ;;  %v1473_v33 = vmul.f32 0.5, %v1408_v25 }
 0x323   : > { %2665 = verf.f32 %v1498_v34  ;;  %v1500_v4 = vmul.f32 0.70710677, %v1410_v35  ;;  %v1474_v39 = vmul.f32 0.5, %v1410_v35 }
 0x324   : > { %2667 = verf.f32 %v1499_v27  ;;  %v1501_v7 = vmul.f32 0.70710677, %v1412_v63  ;;  %v1475_v2 = vmul.f32 0.5, %v1412_v63 }
 0x325   : > { %2669 = verf.f32 %v1500_v4 }
 0x326   : > { %2671 = verf.f32 %v1501_v7  ;;  %v1415_v30 = vpop.f32.mrb[4].mxu0 }
 0x327   : > { %v1416_v11 = vadd.f32 %v1415_v30, %v3663_v24  ;;  %v1417_v16 = vpop.f32.mrb[5].mxu0 }
 0x328   : > { %v1418_v17 = vadd.f32 %v1417_v16, %v3667_v55  ;;  %v1419_v5 = vpop.f32.mrb[6].mxu0 }
 0x329   : > { %v1502_v6 = vmul.f32 0.70710677, %v1416_v11  ;;  %v1420_v12 = vadd.f32 %v1419_v5, %v3663_v24  ;;  %v1421_v61 = vpop.f32.mrb[7].mxu0  ;;  %v1476_v60 = vmul.f32 0.5, %v1416_v11 }
 0x32a   : > { %v1503_v62 = vmul.f32 0.70710677, %v1418_v17  ;;  %v1422_v13 = vadd.f32 %v1421_v61, %v3667_v55  ;;  %v1477_v63 = vmul.f32 0.5, %v1418_v17 }
 0x32b   : > { %2673 = verf.f32 %v1502_v6  ;;  %v1504_v22 = vmul.f32 0.70710677, %v1420_v12  ;;  %v1478_v34 = vmul.f32 0.5, %v1420_v12 }
 0x32c   : > { %2675 = verf.f32 %v1503_v62  ;;  %v1505_v58 = vmul.f32 0.70710677, %v1422_v13  ;;  %v1479_v4 = vmul.f32 0.5, %v1422_v13 }
 0x32d   : > { %v2666_v59 = vpop.eup %2665  ;;  %2677 = verf.f32 %v1504_v22 }
 0x32e   : > { %v2668_v36 = vpop.eup %2667  ;;  %2679 = verf.f32 %v1505_v58  ;;  %v1425_v37 = vpop.f32.mrb[8].mxu0  ;;  %v1550_v50 = vadd.f32 1.0, %v2666_v59 }
 0x32f   : > { %v2670_v14 = vpop.eup %2669  ;;  %v3678_v51 = vadd.f32 %v1425_v37, %v3663_v24  ;;  %v1427_v29 = vpop.f32.mrb[9].mxu0  ;;  %v1551_v23 = vadd.f32 1.0, %v2668_v36 }
 0x330   : > { %v2672_v38 = vpop.eup %2671  ;;  %v1552_v43 = vadd.f32 1.0, %v2670_v14  ;;  %v3681_v44 = vadd.f32 %v1427_v29, %v3667_v55  ;;  %v1429_v40 = vpop.f32.mrb[10].mxu0  ;;  %v1576_v32 = vmul.f32 %v1550_v50, %v1472_v15 }
 0x331   : > { %v1506_v10 = vmul.f32 0.70710677, %v3678_v51  ;;  %v3685_v28 = vadd.f32 %v1429_v40, %v3663_v24  ;;  %v1431_v41 = vpop.f32.mrb[11].mxu0  ;;  %v1553_v0 = vadd.f32 1.0, %v2672_v38  ;;  %v1577_v42 = vmul.f32 %v1551_v23, %v1473_v33 }
 0x332   : > { %v1578_v1 = vmul.f32 %v1552_v43, %v1474_v39  ;;  %v1507_v3 = vmul.f32 0.70710677, %v3681_v44  ;;  %v3689_v31 = vadd.f32 %v1431_v41, %v3667_v55  ;;  %v1480_v40 = vmul.f32 0.5, %v3678_v51 }
 0x333   : > { %2681 = verf.f32 %v1506_v10  ;;  %v1508_v18 = vmul.f32 0.70710677, %v3685_v28  ;;  %v1579_v8 = vmul.f32 %v1553_v0, %v1475_v2  ;;  %v1482_v23 = vmul.f32 0.5, %v3685_v28 }
 0x334   : > { %2683 = verf.f32 %v1507_v3  ;;  %v1509_v19 = vmul.f32 0.70710677, %v3689_v31  ;;  %v1628_v20 = vpack.c.bf16 %v1578_v1, %v1576_v32  ;;  %v1481_v0 = vmul.f32 0.5, %v3681_v44 }
 0x335   : > { %v2674_v9 = vpop.eup %2673  ;;  %2685 = verf.f32 %v1508_v18  ;;  %v1629_v53 = vpack.c.bf16 %v1579_v8, %v1577_v42  ;;  %v1483_v1 = vmul.f32 0.5, %v3689_v31 }
 0x336   : > { %v2676_v21 = vpop.eup %2675  ;;  %v1554_v49 = vadd.f32 1.0, %v2674_v9  ;;  %2687 = verf.f32 %v1509_v19  ;;  %v1435_v52 = vpop.f32.mrb[12].mxu0 }
 0x337   : > { %v2678_v46 = vpop.eup %2677  ;;  %v1555_v47 = vadd.f32 1.0, %v2676_v21  ;;  %v3694_v48 = vadd.f32 %v1435_v52, %v3663_v24  ;;  %v1437_v56 = vpop.f32.mrb[13].mxu0  ;;  %1866 = vmatprep.mubr.bf16.mxu1 %v1629_v53 }
 0x338   : > { %v2680_v25 = vpop.eup %2679  ;;  %v1556_v35 = vadd.f32 1.0, %v2678_v46  ;;  %v3697_v26 = vadd.f32 %v1437_v56, %v3667_v55  ;;  %v1439_v27 = vpop.f32.mrb[14].mxu0  ;;  %1867 = vmatmul.mubr.bf16.vlgmr.msra.gmra.mrb[0].mxu1 %v1628_v20  ;;  %v1580_v5 = vmul.f32 %v1554_v49, %v1476_v60 }
 0x339   : > { %v1557_v7 = vadd.f32 1.0, %v2680_v25  ;;  %v1510_v30 = vmul.f32 0.70710677, %v3694_v48  ;;  %v1441_v16 = vpop.f32.mrb[15].mxu0  ;;  %v1440_v11 = vadd.f32 %v1439_v27, %v3663_v24  ;;  %v1581_v12 = vmul.f32 %v1555_v47, %v1477_v63 }
 0x33a   : > { %v1582_v6 = vmul.f32 %v1556_v35, %v1478_v34  ;;  %v1511_v61 = vmul.f32 0.70710677, %v3697_v26  ;;  %v1442_v22 = vadd.f32 %v1441_v16, %v3667_v55  ;;  %v1484_v60 = vmul.f32 0.5, %v3694_v48 }
 0x33b   : > { %v1583_v62 = vmul.f32 %v1557_v7, %v1479_v4  ;;  %2689 = verf.f32 %v1510_v30  ;;  %v1512_v58 = vmul.f32 0.70710677, %v1440_v11  ;;  %v1485_v4 = vmul.f32 0.5, %v3697_v26 }
 0x33c   : > { %2691 = verf.f32 %v1511_v61  ;;  %v1630_v17 = vpack.c.bf16 %v1582_v6, %v1580_v5  ;;  %v1513_v59 = vmul.f32 0.70710677, %v1442_v22  ;;  %v1486_v7 = vmul.f32 0.5, %v1440_v11 }
 0x33d   : > { %v2682_v13 = vpop.eup %2681  ;;  %v1631_v36 = vpack.c.bf16 %v1583_v62, %v1581_v12  ;;  %2693 = verf.f32 %v1512_v58  ;;  %v1487_v6 = vmul.f32 0.5, %v1442_v22 }
 0x33e   : > { %v2684_v37 = vpop.eup %2683  ;;  %v1558_v14 = vadd.f32 1.0, %v2682_v13  ;;  %v1445_v15 = vpop.f32.mrb[16].mxu0  ;;  %2695 = verf.f32 %v1513_v59 }
 0x33f   : > { %v2686_v50 = vpop.eup %2685  ;;  %v1559_v29 = vadd.f32 1.0, %v2684_v37  ;;  %v3704_v38 = vadd.f32 %v1445_v15, %v3663_v24  ;;  %v1447_v39 = vpop.f32.mrb[17].mxu0  ;;  %1876 = vmatprep.mubr.bf16.mxu1 %v1631_v36 }
 0x340   : > { %v2688_v43 = vpop.eup %2687  ;;  %v1560_v33 = vadd.f32 1.0, %v2686_v50  ;;  %v3709_v10 = vadd.f32 %v1447_v39, %v3667_v55  ;;  %v1449_v41 = vpop.f32.mrb[18].mxu0  ;;  %1877 = vmatmul.mubr.bf16.gmra.mrb[4].mxu1 %v1630_v17  ;;  %v1584_v18 = vmul.f32 %v1558_v14, %v1480_v40 }
 0x341   : > { %v1561_v2 = vadd.f32 1.0, %v2688_v43  ;;  %v1514_v3 = vmul.f32 0.70710677, %v3704_v38  ;;  %v1451_v32 = vpop.f32.mrb[19].mxu0  ;;  %v1450_v28 = vadd.f32 %v1449_v41, %v3663_v24  ;;  %v1585_v42 = vmul.f32 %v1559_v29, %v1481_v0 }
 0x342   : > { %v1586_v19 = vmul.f32 %v1560_v33, %v1482_v23  ;;  %v1515_v51 = vmul.f32 0.70710677, %v3709_v10  ;;  %v1452_v9 = vadd.f32 %v1451_v32, %v3667_v55  ;;  %v1488_v0 = vmul.f32 0.5, %v3704_v38 }
 0x343   : > { %v1587_v8 = vmul.f32 %v1561_v2, %v1483_v1  ;;  %2697 = verf.f32 %v1514_v3  ;;  %v1516_v44 = vmul.f32 0.70710677, %v1450_v28  ;;  %v1490_v1 = vmul.f32 0.5, %v1450_v28 }
 0x344   : > { %2699 = verf.f32 %v1515_v51  ;;  %v1632_v20 = vpack.c.bf16 %v1586_v19, %v1584_v18  ;;  %v1517_v21 = vmul.f32 0.70710677, %v1452_v9  ;;  %v1489_v18 = vmul.f32 0.5, %v3709_v10 }
 0x345   : > { %v2690_v31 = vpop.eup %2689  ;;  %v1633_v49 = vpack.c.bf16 %v1587_v8, %v1585_v42  ;;  %2701 = verf.f32 %v1516_v44  ;;  %v1491_v19 = vmul.f32 0.5, %v1452_v9 }
 0x346   : > { %v2692_v52 = vpop.eup %2691  ;;  %v1455_v53 = vpop.f32.mrb[20].mxu0  ;;  %v1562_v46 = vadd.f32 1.0, %v2690_v31  ;;  %2703 = verf.f32 %v1517_v21 }
 0x347   : > { %v3718_v47 = vadd.f32 %v1455_v53, %v3663_v24  ;;  %v1457_v56 = vpop.f32.mrb[21].mxu0  ;;  %1886 = vmatprep.mubr.bf16.mxu1 %v1633_v49  ;;  %v2694_v25 = vpop.eup %2693  ;;  %v1563_v34 = vadd.f32 1.0, %v2692_v52 }
 0x348   : > { %v3722_v35 = vadd.f32 %v1457_v56, %v3667_v55  ;;  %v1459_v27 = vpop.f32.mrb[22].mxu0  ;;  %v2696_v63 = vpop.eup %2695  ;;  %v1564_v30 = vadd.f32 1.0, %v2694_v25  ;;  %1887 = vmatmul.mubr.bf16.gmra.mrb[8].mxu1 %v1632_v20  ;;  %v1588_v62 = vmul.f32 %v1562_v46, %v1484_v60 }
 0x349   : > { %v1518_v16 = vmul.f32 0.70710677, %v3718_v47  ;;  %v1461_v5 = vpop.f32.mrb[23].mxu0  ;;  %v1565_v61 = vadd.f32 1.0, %v2696_v63  ;;  %v1460_v48 = vadd.f32 %v1459_v27, %v3663_v24  ;;  %v1589_v13 = vmul.f32 %v1563_v34, %v1485_v4 }
 0x34a   : > { %v1519_v12 = vmul.f32 0.70710677, %v3722_v35  ;;  %v1590_v58 = vmul.f32 %v1564_v30, %v1486_v7  ;;  %v1462_v17 = vadd.f32 %v1461_v5, %v3667_v55  ;;  %v1492_v10 = vmul.f32 0.5, %v3718_v47 }
 0x34b   : > { %2705 = verf.f32 %v1518_v16  ;;  %v1591_v59 = vmul.f32 %v1565_v61, %v1487_v6  ;;  %v1520_v26 = vmul.f32 0.70710677, %v1460_v48  ;;  %v1494_v9 = vmul.f32 0.5, %v1460_v48 }
 0x34c   : > { %2707 = verf.f32 %v1519_v12  ;;  %v1521_v36 = vmul.f32 0.70710677, %v1462_v17  ;;  %v1634_v37 = vpack.c.bf16 %v1590_v58, %v1588_v62  ;;  %v1493_v56 = vmul.f32 0.5, %v3722_v35 }
 0x34d   : > { %v2698_v11 = vpop.eup %2697  ;;  %2709 = verf.f32 %v1520_v26  ;;  %v1635_v15 = vpack.c.bf16 %v1591_v59, %v1589_v13  ;;  %v1495_v25 = vmul.f32 0.5, %v1462_v17  ;;  %v1602_v17 = vld [vmem:[#allocation3] sm:$0xff]  ;;  %v1603_v13 = vld [vmem:[#allocation3 + $0x8] sm:$0xff]  ;;  %v1604_v26 = vld [vmem:[#allocation3 + $0x10] sm:$0xff] }
 0x34e   : > { %v2700_v14 = vpop.eup %2699  ;;  %v1465_v22 = vpop.f32.mrb[24].mxu0  ;;  %v1566_v50 = vadd.f32 1.0, %v2698_v11  ;;  %2711 = verf.f32 %v1521_v36 }
 0x34f   : > { %v1466_v29 = vadd.f32 %v1465_v22, %v3663_v24  ;;  %v1467_v39 = vpop.f32.mrb[25].mxu0  ;;  %v2702_v43 = vpop.eup %2701  ;;  %v1567_v40 = vadd.f32 1.0, %v2700_v14  ;;  %1896 = vmatprep.mubr.bf16.mxu1 %v1635_v15 }
 0x350   : > { %v1468_v23 = vadd.f32 %v1467_v39, %v3667_v55  ;;  %v1469_v33 = vpop.f32.mrb[26].mxu0  ;;  %v2704_v41 = vpop.eup %2703  ;;  %v1568_v2 = vadd.f32 1.0, %v2702_v43  ;;  %1897 = vmatmul.mubr.bf16.gmra.mrb[12].mxu1 %v1634_v37  ;;  %v1592_v42 = vmul.f32 %v1566_v50, %v1488_v0  ;;  %v1605_v37 = vld [vmem:[#allocation3 + $0x18] sm:$0xff]  ;;  %v1606_v39 = vld [vmem:[#allocation3 + $0x20] sm:$0xff]  ;;  %v1607_v43 = vld [vmem:[#allocation3 + $0x28] sm:$0xff] }
 0x351   : > { %v1522_v3 = vmul.f32 0.70710677, %v1466_v29  ;;  %v1470_v32 = vpop.f32.mrb[27].mxu0  ;;  %v1569_v51 = vadd.f32 1.0, %v2704_v41  ;;  %v1593_v44 = vmul.f32 %v1567_v40, %v1489_v18  ;;  %v1496_v47 = vmul.f32 0.5, %v1466_v29  ;;  %v1609_v0 = vld [vmem:[#allocation3 + $0x38] sm:$0xff] }
 0x352   : > { %v1523_v24 = vmul.f32 0.70710677, %v1468_v23  ;;  %v1594_v8 = vmul.f32 %v1568_v2, %v1490_v1  ;;  %v1497_v61 = vmul.f32 0.5, %v1468_v23  ;;  %v1608_v23 = vld [vmem:[#allocation3 + $0x30] sm:$0xff] }
 0x353   : > { %2713 = verf.f32 %v1522_v3  ;;  %v1595_v55 = vmul.f32 %v1569_v51, %v1491_v19  ;;  %v1610_v19 = vld [vmem:[#allocation3 + $0x40] sm:$0xff]  ;;  %v1611_v51 = vld [vmem:[#allocation3 + $0x48] sm:$0xff] }
 0x354   : > { %2715 = verf.f32 %v1523_v24  ;;  %v1636_v31 = vpack.c.bf16 %v1594_v8, %v1592_v42  ;;  %v1612_v42 = vld [vmem:[#allocation3 + $0x50] sm:$0xff] }
 0x355   : > { %v2706_v20 = vpop.eup %2705  ;;  %v1637_v38 = vpack.c.bf16 %v1595_v55, %v1593_v44  ;;  %v1613_v55 = vld [vmem:[#allocation3 + $0x58] sm:$0xff] }
 0x356   : > { %v2708_v21 = vpop.eup %2707  ;;  %v1570_v28 = vadd.f32 1.0, %v2706_v20 }
 0x357   : > { %v2710_v49 = vpop.eup %2709  ;;  %v1571_v52 = vadd.f32 1.0, %v2708_v21  ;;  %1906 = vmatprep.mubr.bf16.mxu1 %v1637_v38 }
 0x358   : > { %v2712_v53 = vpop.eup %2711  ;;  %v1572_v46 = vadd.f32 1.0, %v2710_v49  ;;  %1907 = vmatmul.mubr.bf16.gmra.mrb[16].mxu1 %v1636_v31  ;;  %v1596_v34 = vmul.f32 %v1570_v28, %v1492_v10  ;;  %v1614_v49 = vld [vmem:[#allocation3 + $0x60] sm:$0xff]  ;;  %v1616_v10 = vld [vmem:[#allocation3 + $0x70] sm:$0xff] }
 0x359   : > { %v1573_v60 = vadd.f32 1.0, %v2712_v53  ;;  %v1597_v63 = vmul.f32 %v1571_v52, %v1493_v56  ;;  %v1615_v52 = vld [vmem:[#allocation3 + $0x68] sm:$0xff]  ;;  %v1617_v56 = vld [vmem:[#allocation3 + $0x78] sm:$0xff] }
 0x35a   : > { %v1598_v27 = vmul.f32 %v1572_v46, %v1494_v9 }
 0x35b   : > { %v1599_v4 = vmul.f32 %v1573_v60, %v1495_v25 }
 0x35c   : > { %v1638_v30 = vpack.c.bf16 %v1598_v27, %v1596_v34 }
 0x35d   : > { %v2714_v7 = vpop.eup %2713  ;;  %v1639_v5 = vpack.c.bf16 %v1599_v4, %v1597_v63  ;;  %v1618_v4 = vld [vmem:[#allocation3 + $0x80] sm:$0xff] }
 0x35e   : > { %v2716_v16 = vpop.eup %2715  ;;  %v1574_v6 = vadd.f32 1.0, %v2714_v7  ;;  %v1619_v7 = vld [vmem:[#allocation3 + $0x88] sm:$0xff] }
 0x35f   : > { %v1575_v12 = vadd.f32 1.0, %v2716_v16  ;;  %1916 = vmatprep.mubr.bf16.mxu1 %v1639_v5  ;;  %v1620_v16 = vld [vmem:[#allocation3 + $0x90] sm:$0xff] }
 0x360   : > { %1917 = vmatmul.mubr.bf16.gmra.mrb[20].mxu1 %v1638_v30  ;;  %v1600_v58 = vmul.f32 %v1574_v6, %v1496_v47 }
 0x361   : > { %v1601_v48 = vmul.f32 %v1575_v12, %v1497_v61  ;;  %v1621_v61 = vld [vmem:[#allocation3 + $0x98] sm:$0xff] }
 0x362   : > { %v1640_v35 = vpack.c.bf16 %v1600_v58, %v1600_v58 }
 0x363   : > { %v1641_v62 = vpack.c.bf16 %v1601_v48, %v1601_v48 }
 0x365   : > { %1926 = vmatprep.mubr.bf16.mxu1 %v1641_v62 }
 0x368   : > { %1927 = vmatmul.mubr.bf16.gmra.mrb[24].mxu1 %v1640_v35  ;;  %v1622_v35 = vld [vmem:[#allocation3 + $0xa0] sm:$0xff] }
 0x40b   : > { %v1868_v59 = vpop.f32.mrb[0].mxu1 }
 0x40c   : > { %v1935_v11 = vadd.f32 %v1868_v59, %v1602_v17  ;;  %v1870_v36 = vpop.f32.mrb[1].mxu1  ;;  %v1623_v17 = vld [vmem:[#allocation3 + $0xa8] sm:$0xff]  ;;  %v1624_v59 = vld [vmem:[#allocation3 + $0xb0] sm:$0xff] }
 0x40d   : > { %v1936_v14 = vadd.f32 %v1870_v36, %v1603_v13  ;;  %v1872_v22 = vpop.f32.mrb[2].mxu1  ;;  %v1625_v36 = vld [vmem:[#allocation3 + $0xb8] sm:$0xff] }
 0x40e   : > { %1961 = vst [vmem:[#allocation3] sm:$0xff] %v1935_v11  ;;  %v1937_v15 = vadd.f32 %v1872_v22, %v1604_v26  ;;  %v1874_v50 = vpop.f32.mrb[3].mxu1 }
 0x40f   : > { %1962 = vst [vmem:[#allocation3 + $0x8] sm:$0xff] %v1936_v14  ;;  %v1938_v29 = vadd.f32 %v1874_v50, %v1605_v37 }
 0x410   : > { %1963 = vst [vmem:[#allocation3 + $0x10] sm:$0xff] %v1937_v15 }
 0x411   : > { %1964 = vst [vmem:[#allocation3 + $0x18] sm:$0xff] %v1938_v29  ;;  %v1626_v29 = vld [vmem:[#allocation3 + $0xc0] sm:$0xff] }
 0x413   : > { %v1878_v40 = vpop.f32.mrb[4].mxu1 }
 0x414   : > { %v1939_v33 = vadd.f32 %v1878_v40, %v1606_v39  ;;  %v1880_v41 = vpop.f32.mrb[5].mxu1  ;;  %v1627_v39 = vld [vmem:[#allocation3 + $0xc8] sm:$0xff] }
 0x415   : > { %v1940_v1 = vadd.f32 %v1880_v41, %v1607_v43  ;;  %v1882_v2 = vpop.f32.mrb[6].mxu1 }
 0x416   : > { %1965 = vst [vmem:[#allocation3 + $0x20] sm:$0xff] %v1939_v33  ;;  %v1941_v3 = vadd.f32 %v1882_v2, %v1608_v23  ;;  %v1884_v32 = vpop.f32.mrb[7].mxu1  ;;  %v2017_v2 = vld [vmem:[%s3918_s17] sm:$0x3] (!%p2380_p8) }
 0x417   : > { %1966 = vst [vmem:[#allocation3 + $0x28] sm:$0xff] %v1940_v1  ;;  %v1942_v18 = vadd.f32 %v1884_v32, %v1609_v0  ;;  %v1991_v1 = vld [vmem:[#allocation3] sm:$0xff] (!%p2380_p8)  ;;  %v3741_v32 = vrot.slane (!%p2380_p8), %v2017_v2, %v1136_v45 }
 0x418   : > { %1967 = vst [vmem:[#allocation3 + $0x30] sm:$0xff] %v1941_v3  ;;  %v1992_v3 = vld [vmem:[#allocation3 + $0x8] sm:$0xff] (!%p2380_p8) }
 0x419   : > { %1968 = vst [vmem:[#allocation3 + $0x38] sm:$0xff] %v1942_v18  ;;  %v3745_v18 = vrot.slane (!%p2380_p8), %v2017_v2, %v1140_v57 }
 0x41b   : > { %v1888_v24 = vpop.f32.mrb[8].mxu1 }
 0x41c   : > { %v1943_v8 = vadd.f32 %v1888_v24, %v1610_v19  ;;  %v1890_v44 = vpop.f32.mrb[9].mxu1  ;;  %v1993_v19 = vld [vmem:[#allocation3 + $0x10] sm:$0xff] (!%p2380_p8) }
 0x41d   : > { %v1944_v20 = vadd.f32 %v1890_v44, %v1611_v51  ;;  %v1892_v31 = vpop.f32.mrb[10].mxu1  ;;  %v1994_v51 = vld [vmem:[#allocation3 + $0x18] sm:$0xff] (!%p2380_p8)  ;;  %v1995_v24 = vld [vmem:[#allocation3 + $0x20] sm:$0xff] (!%p2380_p8)  ;;  %v2031_v45 = vadd.f32 (!%p2380_p8), %v3741_v32, %v1993_v19 }
 0x41e   : > { %1969 = vst [vmem:[#allocation3 + $0x40] sm:$0xff] %v1943_v8  ;;  %v1945_v21 = vadd.f32 %v1892_v31, %v1612_v42  ;;  %v1894_v38 = vpop.f32.mrb[11].mxu1  ;;  %v1996_v42 = vld [vmem:[#allocation3 + $0x28] sm:$0xff] (!%p2380_p8)  ;;  %v2032_v54 = vadd.f32 (!%p2380_p8), %v3745_v18, %v1994_v51 }
 0x41f   : > { %1970 = vst [vmem:[#allocation3 + $0x48] sm:$0xff] %v1944_v20  ;;  %v1946_v28 = vadd.f32 %v1894_v38, %v1613_v55  ;;  %v1997_v8 = vld [vmem:[#allocation3 + $0x30] sm:$0xff] (!%p2380_p8)  ;;  %v2029_v55 = vadd.f32 (!%p2380_p8), %v3741_v32, %v1991_v1  ;;  %v2030_v20 = vadd.f32 (!%p2380_p8), %v3745_v18, %v1992_v3  ;;  %v2033_v38 = vadd.f32 (!%p2380_p8), %v3741_v32, %v1995_v24 }
 0x420   : > { %1971 = vst [vmem:[#allocation3 + $0x50] sm:$0xff] %v1945_v21  ;;  %v1998_v44 = vld [vmem:[#allocation3 + $0x38] sm:$0xff] (!%p2380_p8)  ;;  %2057 = vst [vmem:[%s3275_s7 + $0x10] sm:$0xff] (!%p2380_p8), %v2031_v45 }
 0x421   : > { %1972 = vst [vmem:[#allocation3 + $0x58] sm:$0xff] %v1946_v28  ;;  %v2034_v28 = vadd.f32 (!%p2380_p8), %v3745_v18, %v1996_v42  ;;  %2055 = vst [vmem:[%s3275_s7] sm:$0xff] (!%p2380_p8), %v2029_v55 }
 0x422   : > { %2056 = vst [vmem:[%s3275_s7 + $0x8] sm:$0xff] (!%p2380_p8), %v2030_v20  ;;  %2058 = vst [vmem:[%s3275_s7 + $0x18] sm:$0xff] (!%p2380_p8), %v2032_v54 }
 0x423   : > { %v1898_v53 = vpop.f32.mrb[12].mxu1  ;;  %2059 = vst [vmem:[%s3275_s7 + $0x20] sm:$0xff] (!%p2380_p8), %v2033_v38  ;;  %2060 = vst [vmem:[%s3275_s7 + $0x28] sm:$0xff] (!%p2380_p8), %v2034_v28 }
 0x424   : > { %v1947_v9 = vadd.f32 %v1898_v53, %v1614_v49  ;;  %v1900_v46 = vpop.f32.mrb[13].mxu1  ;;  %v2035_v49 = vadd.f32 (!%p2380_p8), %v3741_v32, %v1997_v8 }
 0x425   : > { %v1948_v25 = vadd.f32 %v1900_v46, %v1615_v52  ;;  %v1902_v60 = vpop.f32.mrb[14].mxu1  ;;  %v1999_v57 = vld [vmem:[#allocation3 + $0x40] sm:$0xff] (!%p2380_p8)  ;;  %v2036_v52 = vadd.f32 (!%p2380_p8), %v3745_v18, %v1998_v44 }
 0x426   : > { %1973 = vst [vmem:[#allocation3 + $0x60] sm:$0xff] %v1947_v9  ;;  %v1949_v34 = vadd.f32 %v1902_v60, %v1616_v10  ;;  %v1904_v27 = vpop.f32.mrb[15].mxu1  ;;  %v2000_v31 = vld [vmem:[#allocation3 + $0x48] sm:$0xff] (!%p2380_p8)  ;;  %v2037_v46 = vadd.f32 (!%p2380_p8), %v3741_v32, %v1999_v57  ;;  %2061 = vst [vmem:[%s3275_s7 + $0x30] sm:$0xff] (!%p2380_p8), %v2035_v49 }
 0x427   : > { %1974 = vst [vmem:[#allocation3 + $0x68] sm:$0xff] %v1948_v25  ;;  %v1950_v63 = vadd.f32 %v1904_v27, %v1617_v56  ;;  %v2001_v21 = vld [vmem:[#allocation3 + $0x50] sm:$0xff] (!%p2380_p8)  ;;  %v2038_v56 = vadd.f32 (!%p2380_p8), %v3745_v18, %v2000_v31  ;;  %2062 = vst [vmem:[%s3275_s7 + $0x38] sm:$0xff] (!%p2380_p8), %v2036_v52 }
 0x428   : > { %1975 = vst [vmem:[#allocation3 + $0x70] sm:$0xff] %v1949_v34  ;;  %v2002_v53 = vld [vmem:[#allocation3 + $0x58] sm:$0xff] (!%p2380_p8)  ;;  %v2039_v25 = vadd.f32 (!%p2380_p8), %v3741_v32, %v2001_v21  ;;  %2063 = vst [vmem:[%s3275_s7 + $0x40] sm:$0xff] (!%p2380_p8), %v2037_v46 }
 0x429   : > { %1976 = vst [vmem:[#allocation3 + $0x78] sm:$0xff] %v1950_v63  ;;  %v2040_v60 = vadd.f32 (!%p2380_p8), %v3745_v18, %v2002_v53  ;;  %2064 = vst [vmem:[%s3275_s7 + $0x48] sm:$0xff] (!%p2380_p8), %v2038_v56 }
 0x42a   : > { %2065 = vst [vmem:[%s3275_s7 + $0x50] sm:$0xff] (!%p2380_p8), %v2039_v25 }
 0x42b   : > { %v1908_v30 = vpop.f32.mrb[16].mxu1  ;;  %2066 = vst [vmem:[%s3275_s7 + $0x58] sm:$0xff] (!%p2380_p8), %v2040_v60 }
 0x42c   : > { %v1951_v5 = vadd.f32 %v1908_v30, %v1618_v4  ;;  %v1910_v6 = vpop.f32.mrb[17].mxu1 }
 0x42d   : > { %v1952_v12 = vadd.f32 %v1910_v6, %v1619_v7  ;;  %v1912_v47 = vpop.f32.mrb[18].mxu1  ;;  %v2003_v10 = vld [vmem:[#allocation3 + $0x60] sm:$0xff] (!%p2380_p8) }
 0x42e   : > { %1977 = vst [vmem:[#allocation3 + $0x80] sm:$0xff] %v1951_v5  ;;  %v1953_v48 = vadd.f32 %v1912_v47, %v1620_v16  ;;  %v1914_v62 = vpop.f32.mrb[19].mxu1  ;;  %v2004_v9 = vld [vmem:[#allocation3 + $0x68] sm:$0xff] (!%p2380_p8)  ;;  %v2041_v4 = vadd.f32 (!%p2380_p8), %v3741_v32, %v2003_v10 }
 0x42f   : > { %1978 = vst [vmem:[#allocation3 + $0x88] sm:$0xff] %v1952_v12  ;;  %v1954_v58 = vadd.f32 %v1914_v62, %v1621_v61  ;;  %v2005_v34 = vld [vmem:[#allocation3 + $0x70] sm:$0xff] (!%p2380_p8)  ;;  %v2042_v7 = vadd.f32 (!%p2380_p8), %v3745_v18, %v2004_v9 }
 0x430   : > { %1979 = vst [vmem:[#allocation3 + $0x90] sm:$0xff] %v1953_v48  ;;  %v2006_v27 = vld [vmem:[#allocation3 + $0x78] sm:$0xff] (!%p2380_p8)  ;;  %v2043_v30 = vadd.f32 (!%p2380_p8), %v3741_v32, %v2005_v34  ;;  %2067 = vst [vmem:[%s3275_s7 + $0x60] sm:$0xff] (!%p2380_p8), %v2041_v4 }
 0x431   : > { %1980 = vst [vmem:[#allocation3 + $0x98] sm:$0xff] %v1954_v58  ;;  %v2044_v16 = vadd.f32 (!%p2380_p8), %v3745_v18, %v2006_v27  ;;  %2068 = vst [vmem:[%s3275_s7 + $0x68] sm:$0xff] (!%p2380_p8), %v2042_v7 }
 0x432   : > { %2069 = vst [vmem:[%s3275_s7 + $0x70] sm:$0xff] (!%p2380_p8), %v2043_v30 }
 0x433   : > { %v1918_v13 = vpop.f32.mrb[20].mxu1  ;;  %2070 = vst [vmem:[%s3275_s7 + $0x78] sm:$0xff] (!%p2380_p8), %v2044_v16 }
 0x434   : > { %v1955_v26 = vadd.f32 %v1918_v13, %v1622_v35  ;;  %v1920_v11 = vpop.f32.mrb[21].mxu1 }
 0x435   : > { %v1956_v37 = vadd.f32 %v1920_v11, %v1623_v17  ;;  %v1922_v14 = vpop.f32.mrb[22].mxu1  ;;  %v2007_v63 = vld [vmem:[#allocation3 + $0x80] sm:$0xff] (!%p2380_p8) }
 0x436   : > { %1981 = vst [vmem:[#allocation3 + $0xa0] sm:$0xff] %v1955_v26  ;;  %v1957_v22 = vadd.f32 %v1922_v14, %v1624_v59  ;;  %v1924_v15 = vpop.f32.mrb[23].mxu1  ;;  %v2008_v5 = vld [vmem:[#allocation3 + $0x88] sm:$0xff] (!%p2380_p8)  ;;  %v2045_v12 = vadd.f32 (!%p2380_p8), %v3741_v32, %v2007_v63 }
 0x437   : > { %1982 = vst [vmem:[#allocation3 + $0xa8] sm:$0xff] %v1956_v37  ;;  %v1958_v50 = vadd.f32 %v1924_v15, %v1625_v36  ;;  %v2009_v6 = vld [vmem:[#allocation3 + $0x90] sm:$0xff] (!%p2380_p8)  ;;  %v2046_v47 = vadd.f32 (!%p2380_p8), %v3745_v18, %v2008_v5 }
 0x438   : > { %1983 = vst [vmem:[#allocation3 + $0xb0] sm:$0xff] %v1957_v22  ;;  %v2010_v61 = vld [vmem:[#allocation3 + $0x98] sm:$0xff] (!%p2380_p8)  ;;  %v2047_v48 = vadd.f32 (!%p2380_p8), %v3741_v32, %v2009_v6  ;;  %2071 = vst [vmem:[%s3275_s7 + $0x80] sm:$0xff] (!%p2380_p8), %v2045_v12 }
 0x439   : > { %1984 = vst [vmem:[#allocation3 + $0xb8] sm:$0xff] %v1958_v50  ;;  %1990 = sbr.rel (%p2380_p8) target bundleno = 1098 (0x44a), region = 68  ;;  %v2048_v62 = vadd.f32 (!%p2380_p8), %v3745_v18, %v2010_v61  ;;  %2072 = vst [vmem:[%s3275_s7 + $0x88] sm:$0xff] (!%p2380_p8), %v2046_v47 }
 0x43a   : > { %2073 = vst [vmem:[%s3275_s7 + $0x90] sm:$0xff] (!%p2380_p8), %v2047_v48 }
 0x43b   : > { %v1928_v43 = vpop.f32.mrb[24].mxu1  ;;  %2074 = vst [vmem:[%s3275_s7 + $0x98] sm:$0xff] (!%p2380_p8), %v2048_v62 }
 0x43c   : > { %v1959_v40 = vadd.f32 %v1928_v43, %v1626_v29  ;;  %v1930_v23 = vpop.f32.mrb[25].mxu1 }
 0x43d   : > { %v1960_v33 = vadd.f32 %v1930_v23, %v1627_v39  ;;  %v1932_v41 = vpop.f32.mrb[26].mxu1  ;;  %v2011_v58 = vld [vmem:[#allocation3 + $0xa0] sm:$0xff] (!%p2380_p8) }
 0x43e   : > { %1985 = vst [vmem:[#allocation3 + $0xc0] sm:$0xff] %v1959_v40  ;;  %v1933_v0 = vpop.f32.mrb[27].mxu1  ;;  %v2012_v35 = vld [vmem:[#allocation3 + $0xa8] sm:$0xff] (!%p2380_p8)  ;;  %v2049_v13 = vadd.f32 (!%p2380_p8), %v3741_v32, %v2011_v58 }
 0x43f   : > { %1986 = vst [vmem:[#allocation3 + $0xc8] sm:$0xff] %v1960_v33  ;;  %v2013_v17 = vld [vmem:[#allocation3 + $0xb0] sm:$0xff] (!%p2380_p8)  ;;  %v2050_v59 = vadd.f32 (!%p2380_p8), %v3745_v18, %v2012_v35 }
 0x440   : > { %v2051_v26 = vadd.f32 %v3741_v32, %v2013_v17  ;;  %v2014_v11 = vld [vmem:[#allocation3 + $0xb8] sm:$0xff]  ;;  %2075 = vst [vmem:[%s3275_s7 + $0xa0] sm:$0xff] %v2049_v13 }
 0x441   : > { %v2052_v14 = vadd.f32 %v3745_v18, %v2014_v11  ;;  %2076 = vst [vmem:[%s3275_s7 + $0xa8] sm:$0xff] %v2050_v59 }
 0x442   : > { %2077 = vst [vmem:[%s3275_s7 + $0xb0] sm:$0xff] %v2051_v26 }
 0x443   : > { %2078 = vst [vmem:[%s3275_s7 + $0xb8] sm:$0xff] %v2052_v14 }
 0x445   : > { %v2015_v36 = vld [vmem:[#allocation3 + $0xc0] sm:$0xff] }
 0x446   : > { %v2016_v37 = vld [vmem:[#allocation3 + $0xc8] sm:$0xff]  ;;  %v2053_v22 = vadd.f32 %v3741_v32, %v2015_v36 }
 0x447   : > { %v2054_v15 = vadd.f32 %v3745_v18, %v2016_v37 }
 0x448   : > { %2079 = vst [vmem:[%s3275_s7 + $0xc0] sm:$0xff] %v2053_v22 }
 0x449   : > { %2080 = vst [vmem:[%s3275_s7 + $0xc8] sm:$0xff] %v2054_v15 }
 0x44a PF: > { %s2082_s30 = scalar_lea.sflag [#allocation6], %s3244_s0  ;;  %p3919_p11 = scmp.ne.s32.totalorder %s3911_s2, 0 }
 0x44b   : > { %s2089_s16 = smul.u32 (%p3919_p11), 13, %s2915_s8 }
 0x44c   : > { %2088 = sbr.rel (!%p3919_p11) target bundleno = 1136 (0x470), region = 72 }
 0x44d   : > { %s2090_s21 = ssub.s32 (%p3919_p11), 25, %s2089_s16 }
 0x44e   : > { %p2091_p13 = scmp.lt.s32.totalorder (%p3919_p11), %s2090_s21, 13 }
 0x453   : > { %s3953_s21 = smov (!%p2091_p13, %s2090_s21), 13 }
 0x454   : > { %s3803_s23 = sshll.u32 %s3953_s21, 8 }
 0x455   : > { %s2096_s9 = ssub.s32 3328, %s3803_s23 }
 0x456   : > { %2097 = vsyncadd %s2082_s30, %s2096_s9  ;;  %p2383_p4 = scmp.ne.s32.totalorder %s3803_s23, 0  ;;  %s2413_s2 = smul.u32 3328, %s2915_s8 }
 0x457   : > { %s2103_s10 = sshll.u32 %s3275_s7, 4  ;;  %s3920_s15 = sld [smem:[#allocation25_spill]]  ;;  %s3816_s10 = int_to_ptr.vmem [resolvable:$true] %s2103_s10 }
 0x458   : > { %s2801_s19 = scalar_lea.vmem %s3816_s10, %s3803_s23  ;;  %s2938_s18 = smov [#allocation10]  }
 0x459   : > { %p2802_p0 = scmp.ne.s32.totalorder %s3816_s10, %s2801_s19  ;;  %s2805_s13 = sshll.u32 %s2938_s18, 4  ;;  %s2806_s13 = int_to_ptr.vmem [resolvable:$false] %s2805_s13 }
 0x45a   : > { %s2807_s8 = scalar_lea.vmem %s2806_s13, 6656  ;;  %p2808_p2 = scmp.lt.s32.totalorder %s3816_s10, %s2806_s13 }
 0x45b   : > { %p2803_p1 = pnand %p2802_p0, %p2383_p4  ;;  %p2809_p12 = scmp.lt.s32.totalorder %s2807_s8, %s2801_s19 }
 0x45d   : > { %s3814_s24 = scalar_lea.hbm %s3920_s15, %s2413_s2  ;;  %p2804_p10 = pneg %p2803_p1 }
 0x45e   : > { %p2810_p7 = por %p2809_p12, %p2808_p2 }
 0x460   : > { %p2811_p6 = pnand %p2810_p7, %p2804_p10 }
 0x462   : > { %2814 = shalt.err (!%p2811_p6)
}
 0x463   : > { %s2815_s7 = scalar_lea.hbm %s3814_s24, %s3803_s23  ;;  %s2819_s12 = scalar_lea.hbm %s3920_s15, 6400 }
 0x464   : > { %p2816_p5 = scmp.ne.s32.totalorder %s3814_s24, %s2815_s7  ;;  %p2820_p8 = scmp.lt.u32.totalorder %s3814_s24, %s3920_s15 }
 0x465   : > { %p2821_p11 = scmp.lt.u32.totalorder %s2819_s12, %s2815_s7  ;;  %p2823_p0 = scmp.lt.u32.totalorder %s2815_s7, %s3814_s24 }
 0x466   : > { %p2817_p9 = pnand %p2816_p5, %p2383_p4 }
 0x467   : > { %p2822_p13 = por %p2821_p11, %p2820_p8 }
 0x468   : > { %p2818_p3 = pneg %p2817_p9 }
 0x469   : > { %p2824_p1 = por %p2823_p0, %p2822_p13 }
 0x46b   : > { %p2825_p10 = pnand %p2824_p1, %p2818_p3 }
 0x46d   : > { %2828 = shalt.err (!%p2825_p10)
}
 0x46e   : > { %s2939_s16 = smov 256   ;;  %s2940_s21 = smov 16  }
 0x46f   : > { %2109 = dma.vmem_to_hbm [thread:$0]  (%p2383_p4), %s3816_s10, %s3803_s23, %s3814_s24, %s2082_s30, %s2939_s16, %s2939_s16, %s2940_s21  }
 0x470 PF: > { %p2426_p2 = scmp.ge.s32.totalorder %s2927_s11, 2  ;;  %s2118_s9 = sand.u32 1, %s2899_s27  }
 0x471   : > { %p3921_p12 = scmp.ne.s32.totalorder %s3912_s6, 0  ;;  %s2119_s2 = scalar_lea.sflag [#allocation6], %s2118_s9 }
 0x473   : > { %p2423_p7 = pnand %p2426_p2, %p3921_p12 }
 0x475   : > { %2882 = dma.done.wait (!%p2423_p7), %s2119_s2, 3328  }
 0x476   : > { %2884 = vsyncadd (!%p2423_p7), %s2119_s2, 4294963968  ;;  %s26_s11 = sadd.s32 1, %s2927_s11   ;;  %s3922_s1 = sld [smem:[#allocation20_spill]] }
 0x477   : > { %p23_p6 = scmp.ge.s32.totalorder %s26_s11, 10   ;;  %s3923_s0 = sld [smem:[#allocation14_spill]] }
 0x478   : > { %s3924_s29 = sld [smem:[#allocation19_spill]]  ;;  %s3925_s30 = sld [smem:[#allocation15_spill]] }
 0x479   : > { %s3926_s8 = sld [smem:[#allocation16_spill]]  ;;  %s3927_s9 = sld [smem:[#allocation17_spill]] }
 0x47a   : > { %s3928_s10 = sld [smem:[#allocation18_spill]]  ;;  %s3929_s24 = smov %s2891_s25 }
 0x47b   : > { %s3930_s25 = smov %s2895_s26  ;;  %s3932_s27 = smov %s2903_s28 }
 0x47c   : > { %s3931_s26 = smov %s3922_s1  ;;  %25 = sbr.rel (!%p23_p6) target bundleno = 17 (0x11), region = 128 }
 0x47d   : > { %s3933_s28 = smov %s3923_s0 }
 0x483   :  { %2124 = vsyncpa [#allocation5], 1 }
 0x484   :  { %2126 = vsyncpa [#allocation5 + $0x1], 1 }
 0x485   :  { %2127 = vsyncpa [#allocation8], 1 }
 0x486   :  { %2129 = vsyncpa [#allocation8 + $0x1], 1 }
 0x487   :  { %2130 = vsyncpa [#allocation6], 1 }
 0x488   :  { %2132 = vsyncpa [#allocation6 + $0x1], 1 }

</bundles_post_ra>
